<compile_context>
chip_gen: v6e
topology: v6e:2x2x1
jax: 0.10.0
libtpu: 0.0.40
codegen_flags: <defaults>
</compile_context>

<pallas_src>
from functools import partial

import jax
import jax.numpy as jnp
from jax import lax
from jax.experimental import pallas as pl
from jax.experimental.pallas import tpu as pltpu


_LANE = 128


def _round_up(v, m):
    return (v + m - 1) // m * m


def _hete_conv_kernel(x_ref, ntype_ref, efeat_ref, etype_ref, src_ref, dst_ref,
                      wnode_ref, wmsg_ref, out_ref):
    # x_ref:     [Np, Din_p]         f32  (zero-padded node features)
    # ntype_ref: [Np, 1]             i32  (node type in {0,1}, -1 on padded rows)
    # efeat_ref: [Ep, Dout_p]        f32  (edge feats pre-placed in lanes [dout, dout+dedge))
    # etype_ref: [Ep, 1]             i32  (edge type in {0,1,2}, -1 on padded rows)
    # src_ref:   [1, Ep]             i32  (edge_index[0]; -1 on padded edges)
    # dst_ref:   [1, Ep]             i32  (edge_index[1]; -1 on padded edges)
    # wnode_ref: [2*Din_p, Dout_p]   f32  (per-node-type weights stacked along K)
    # wmsg_ref:  [3*Dout_p, Dout_p]  f32  (per-edge-type message weights stacked along K)
    # out_ref:   [Np, Dout_p]        f32
    x = x_ref[...]
    ntype = ntype_ref[...]                                   # [Np, 1]
    n_pad = x.shape[0]
    e_pad = efeat_ref.shape[0]

    # ---- heterogeneous node transform: mask x per type, stack along K, one matmul ----
    xk = jnp.concatenate([jnp.where(ntype == 0, x, 0.0),
                          jnp.where(ntype == 1, x, 0.0)], axis=-1)   # [Np, 2*Din_p]
    h = jnp.dot(xk, wnode_ref[...],
                preferred_element_type=jnp.float32)                  # [Np, Dout_p]

    # ---- gather source-node features via [N, E] one-hot (E on lanes) on the MXU ----
    node_iota = lax.broadcasted_iota(jnp.int32, (n_pad, e_pad), 0)    # [Np, Ep]
    onehot_src = jnp.where(node_iota == src_ref[...], 1.0, 0.0)       # [Np, Ep]
    x_src = lax.dot_general(onehot_src, h, (((0,), (0,)), ((), ())),
                            preferred_element_type=jnp.float32)       # [Ep, Dout_p]

    # ---- heterogeneous message transform ----
    # m_in = cat(x_j, edge_feature) realized as a lane-dense add: h's lanes >= dout
    # are zero, efeat is pre-placed in lanes [dout, dout+dedge).
    m_in = x_src + efeat_ref[...]                                     # [Ep, Dout_p]
    etype = etype_ref[...]                                            # [Ep, 1]
    mk = jnp.concatenate([jnp.where(etype == 0, m_in, 0.0),
                          jnp.where(etype == 1, m_in, 0.0),
                          jnp.where(etype == 2, m_in, 0.0)], axis=-1)  # [Ep, 3*Dout_p]
    msg = jnp.dot(mk, wmsg_ref[...],
                  preferred_element_type=jnp.float32)                 # [Ep, Dout_p]

    # norm is None (normalize_adj=False, edge_weight=None) -> no per-edge scaling.
    # bias is None (bias=False) -> no update-step bias add.

    # ---- scatter-add aggregation at destination nodes via one-hot matmul ----
    onehot_dst = jnp.where(node_iota == dst_ref[...], 1.0, 0.0)       # [Np, Ep]
    out_ref[...] = jnp.dot(onehot_dst, msg, preferred_element_type=jnp.float32)


def pack_hete_conv_weights(w_node, w_msg, dedge):
    """One-time (per-layer) packing of the per-type Linear weights.

    w_node: [2, Din, Dout]          ([in, out] layout)
    w_msg:  [3, Dout + Dedge, Dout] ([in, out] layout)
    Returns (wnode_k, wmsg_k) stacked along the contraction (K) axis:
      wnode_k: [2*Din_p, Dout_p]
      wmsg_k:  [3*Dout_p, Dout_p]  (edge-feature rows placed at [t*Dout_p+dout, ...+dedge))
    """
    f32 = jnp.float32
    din = w_node.shape[1]
    dout = w_node.shape[2]
    din_p = _round_up(din, _LANE)
    dout_p = _round_up(dout, _LANE)
    assert dout + dedge <= dout_p, "edge feature does not fit in the padded lanes"

    wnode_k = jnp.zeros((2 * din_p, dout_p), f32)
    for t in range(2):
        wnode_k = wnode_k.at[t * din_p:t * din_p + din, :dout].set(
            w_node[t].astype(f32))

    wmsg_k = jnp.zeros((3 * dout_p, dout_p), f32)
    for t in range(3):
        wmsg_k = wmsg_k.at[t * dout_p:t * dout_p + dout, :dout].set(
            w_msg[t, :dout, :].astype(f32))
        wmsg_k = wmsg_k.at[t * dout_p + dout:t * dout_p + dout + dedge, :dout].set(
            w_msg[t, dout:, :].astype(f32))
    return wnode_k, wmsg_k


def _vmem_limit_bytes(n_p, e_p, din_p, dout_p):
    # Resident footprint of the single-block design (f32 words), with headroom.
    words = (
        n_p * din_p            # x
        + n_p * _LANE          # ntype (lane-padded)
        + e_p * dout_p         # efeat
        + e_p * _LANE          # etype (lane-padded)
        + 2 * 8 * e_p          # src / dst (sublane-padded)
        + 2 * din_p * dout_p   # wnode_k
        + 3 * dout_p * dout_p  # wmsg_k
        + n_p * dout_p         # out
        + n_p * 2 * din_p      # xk
        + n_p * dout_p         # h
        + 3 * n_p * e_p        # iota + 2 one-hots
        + 3 * e_p * dout_p     # x_src, m_in, msg
        + 3 * e_p * dout_p     # mk
    )
    limit = 2 * 4 * words + (4 << 20)
    return int(min(max(limit, 16 << 20), 64 << 20))


@partial(jax.jit, static_argnames=("dout",))
def general_edge_hete_conv(x, node_type, edge_index, edge_feature, edge_type,
                           wnode_k, wmsg_k, *, dout):
    """Forward pass of GeneralEdgeHeteConv (bias=False, agg='add', single direction).

    x:            [N, Din]      float32 node features
    node_type:    [N]           int32 in {0, 1}
    edge_index:   [2, E]        int32 (row 0 = source j, row 1 = target i)
    edge_feature: [E, Dedge]    float32
    edge_type:    [E]           int32 in {0, 1, 2}
    wnode_k/wmsg_k: packed weights from pack_hete_conv_weights()
    returns:      [N, dout] float32
    """
    N, din = x.shape
    E, dedge = edge_feature.shape
    din_p = wnode_k.shape[0] // 2
    dout_p = wnode_k.shape[1]

    # Pad N and E to 128: E is the lane axis of the one-hots / src / dst and the
    # K depth of the scatter matmul; N is the K depth of the gather matmul.
    n_p = _round_up(N, _LANE)
    e_p = _round_up(E, _LANE)

    f32 = jnp.float32
    i32 = jnp.int32

    # Zero-pad features; -1 sentinels on padded type / index rows select nothing
    # (padded edges gather node "-1" = nobody, produce a 0 message, scatter to nobody).
    x_p = jnp.zeros((n_p, din_p), f32).at[:N, :din].set(x.astype(f32))
    efeat_p = jnp.zeros((e_p, dout_p), f32).at[:E, dout:dout + dedge].set(
        edge_feature.astype(f32))
    ntype_p = jnp.full((n_p, 1), -1, i32).at[:N, 0].set(node_type.astype(i32))
    etype_p = jnp.full((e_p, 1), -1, i32).at[:E, 0].set(edge_type.astype(i32))
    src_p = jnp.full((1, e_p), -1, i32).at[0, :E].set(edge_index[0].astype(i32))
    dst_p = jnp.full((1, e_p), -1, i32).at[0, :E].set(edge_index[1].astype(i32))

    vmem_spec = pl.BlockSpec(memory_space=pltpu.MemorySpace.VMEM)

    out_p = pl.pallas_call(
        _hete_conv_kernel,
        out_shape=jax.ShapeDtypeStruct((n_p, dout_p), f32),
        in_specs=[vmem_spec] * 8,
        out_specs=vmem_spec,
        compiler_params=pltpu.CompilerParams(
            vmem_limit_bytes=_vmem_limit_bytes(n_p, e_p, din_p, dout_p)),
    )(x_p, ntype_p, efeat_p, etype_p, src_p, dst_p, wnode_k, wmsg_k)

    return out_p[:N, :dout]


def _reference(x, node_type, edge_index, edge_feature, edge_type, w_node, w_msg):
    """Pure-JAX reference matching the PyTorch forward semantics."""
    N = x.shape[0]
    dout = w_node.shape[-1]
    h = jnp.zeros((N, dout), jnp.float32)
    for t in range(2):
        h = h + (node_type[:, None] == t) * (x @ w_node[t])
    src, dst = edge_index[0], edge_index[1]
    x_j = h[src]                                             # source features
    msg_in = jnp.concatenate([x_j, edge_feature], axis=-1)   # single direction
    E = msg_in.shape[0]
    msg = jnp.zeros((E, dout), jnp.float32)
    for t in range(3):
        msg = msg + (edge_type[:, None] == t) * (msg_in @ w_msg[t])
    return jax.ops.segment_sum(msg, dst, num_segments=N)


if __name__ == "__main__":
    # Small synthetic graph consistent with the module.
    N, E = 16, 32          # nodes, edges
    DIN, DOUT = 16, 32     # in_channels, out_channels
    DEDGE = 8              # cfg.dataset.edge_dim

    key = jax.random.PRNGKey(0)
    k1, k2, k3, k4, k5, k6, k7 = jax.random.split(key, 7)

    x = jax.random.normal(k1, (N, DIN), dtype=jnp.float32)
    node_type = jax.random.randint(k2, (N,), 0, 2, dtype=jnp.int32)
    edge_index = jax.random.randint(k3, (2, E), 0, N, dtype=jnp.int32)
    edge_feature = jax.random.normal(k4, (E, DEDGE), dtype=jnp.float32)
    edge_type = jax.random.randint(k5, (E,), 0, 3, dtype=jnp.int32)

    # Deterministic parameter init (shapes from the module's __init__),
    # stored as [in, out] (transposed nn.Linear layout).
    w_node = jax.random.normal(k6, (2, DIN, DOUT), dtype=jnp.float32) * 0.1
    w_msg = jax.random.normal(k7, (3, DOUT + DEDGE, DOUT), dtype=jnp.float32) * 0.1

    # One-time per-layer weight packing (hoisted out of the forward call).
    wnode_k, wmsg_k = pack_hete_conv_weights(w_node, w_msg, DEDGE)
    wnode_k = jax.block_until_ready(wnode_k)
    wmsg_k = jax.block_until_ready(wmsg_k)

    out = general_edge_hete_conv(x, node_type, edge_index, edge_feature,
                                 edge_type, wnode_k, wmsg_k, dout=DOUT)
    out = jax.block_until_ready(out)

    ref = _reference(x, node_type, edge_index, edge_feature, edge_type,
                     w_node, w_msg)
    assert out.shape == (N, DOUT)
    assert jnp.allclose(out, ref, rtol=1e-4, atol=1e-4), "mismatch vs reference"

    print("KERNEL_OK")
</pallas_src>

<mosaic_0001>
module attributes {stable_mosaic.version = 11 : i64} {
  func.func @_hete_conv_kernel(%arg0: memref<128x128xf32, #tpu.memory_space<vmem>>, %arg1: memref<128x1xi32, #tpu.memory_space<vmem>>, %arg2: memref<128x128xf32, #tpu.memory_space<vmem>>, %arg3: memref<128x1xi32, #tpu.memory_space<vmem>>, %arg4: memref<1x128xi32, #tpu.memory_space<vmem>>, %arg5: memref<1x128xi32, #tpu.memory_space<vmem>>, %arg6: memref<256x128xf32, #tpu.memory_space<vmem>>, %arg7: memref<384x128xf32, #tpu.memory_space<vmem>>, %arg8: memref<128x128xf32, #tpu.memory_space<vmem>>) attributes {dimension_semantics = [], scalar_prefetch = 0 : i64, scratch_operands = 0 : i64, tpu.core_type = #tpu.core_type<tc>} {
    %c0 = arith.constant 0 : index
    %c0_0 = arith.constant 0 : index
    %0 = vector.load %arg0[%c0, %c0_0] : memref<128x128xf32, #tpu.memory_space<vmem>>, vector<128x128xf32>
    %c0_1 = arith.constant 0 : index
    %c0_2 = arith.constant 0 : index
    %1 = vector.load %arg1[%c0_1, %c0_2] : memref<128x1xi32, #tpu.memory_space<vmem>>, vector<128x1xi32>
    %c0_i32 = arith.constant 0 : i32
    %2 = vector.broadcast %c0_i32 : i32 to vector<128x1xi32>
    %3 = arith.cmpi eq, %1, %2 : vector<128x1xi32>
    %cst = arith.constant 0.000000e+00 : f32
    %4 = vector.shape_cast %3 : vector<128x1xi1> to vector<128x1xi1>
    %5 = vector.broadcast %4 : vector<128x1xi1> to vector<128x128xi1>
    %6 = vector.broadcast %cst : f32 to vector<128x128xf32>
    %7 = arith.select %5, %0, %6 : vector<128x128xi1>, vector<128x128xf32>
    %c1_i32 = arith.constant 1 : i32
    %8 = vector.broadcast %c1_i32 : i32 to vector<128x1xi32>
    %9 = arith.cmpi eq, %1, %8 : vector<128x1xi32>
    %cst_3 = arith.constant 0.000000e+00 : f32
    %10 = vector.shape_cast %9 : vector<128x1xi1> to vector<128x1xi1>
    %11 = vector.broadcast %10 : vector<128x1xi1> to vector<128x128xi1>
    %12 = vector.broadcast %cst_3 : f32 to vector<128x128xf32>
    %13 = arith.select %11, %0, %12 : vector<128x128xi1>, vector<128x128xf32>
    %14 = tpu.concatenate %7, %13 in 1 : vector<128x128xf32>, vector<128x128xf32> -> vector<128x256xf32>
    %c0_4 = arith.constant 0 : index
    %c0_5 = arith.constant 0 : index
    %15 = vector.load %arg6[%c0_4, %c0_5] : memref<256x128xf32, #tpu.memory_space<vmem>>, vector<256x128xf32>
    %cst_6 = arith.constant dense<0.000000e+00> : vector<128x128xf32>
    %16 = tpu.matmul %14, %15, %cst_6 {dimension_numbers = #tpu.dot_dimension_numbers<[1], [0], [0], [1], [0, 0, 1, 1], [], []>} : vector<128x256xf32>, vector<256x128xf32>, vector<128x128xf32> -> vector<128x128xf32>
    %17 = tpu.iota {dimensions = array<i32: 0>} : vector<128x128xi32>
    %c0_7 = arith.constant 0 : index
    %c0_8 = arith.constant 0 : index
    %18 = vector.load %arg4[%c0_7, %c0_8] : memref<1x128xi32, #tpu.memory_space<vmem>>, vector<1x128xi32>
    %19 = vector.broadcast %18 : vector<1x128xi32> to vector<128x128xi32>
    %20 = arith.cmpi eq, %17, %19 : vector<128x128xi32>
    %cst_9 = arith.constant 1.000000e+00 : f32
    %cst_10 = arith.constant 0.000000e+00 : f32
    %21 = vector.broadcast %cst_9 : f32 to vector<128x128xf32>
    %22 = vector.broadcast %cst_10 : f32 to vector<128x128xf32>
    %23 = arith.select %20, %21, %22 : vector<128x128xi1>, vector<128x128xf32>
    %cst_11 = arith.constant dense<0.000000e+00> : vector<128x128xf32>
    %24 = tpu.matmul %23, %16, %cst_11 {dimension_numbers = #tpu.dot_dimension_numbers<[0], [0], [1], [1], [0, 1, 1, 1], [], []>} : vector<128x128xf32>, vector<128x128xf32>, vector<128x128xf32> -> vector<128x128xf32>
    %c0_12 = arith.constant 0 : index
    %c0_13 = arith.constant 0 : index
    %25 = vector.load %arg2[%c0_12, %c0_13] : memref<128x128xf32, #tpu.memory_space<vmem>>, vector<128x128xf32>
    %26 = arith.addf %24, %25 : vector<128x128xf32>
    %c0_14 = arith.constant 0 : index
    %c0_15 = arith.constant 0 : index
    %27 = vector.load %arg3[%c0_14, %c0_15] : memref<128x1xi32, #tpu.memory_space<vmem>>, vector<128x1xi32>
    %c0_i32_16 = arith.constant 0 : i32
    %28 = vector.broadcast %c0_i32_16 : i32 to vector<128x1xi32>
    %29 = arith.cmpi eq, %27, %28 : vector<128x1xi32>
    %cst_17 = arith.constant 0.000000e+00 : f32
    %30 = vector.shape_cast %29 : vector<128x1xi1> to vector<128x1xi1>
    %31 = vector.broadcast %30 : vector<128x1xi1> to vector<128x128xi1>
    %32 = vector.broadcast %cst_17 : f32 to vector<128x128xf32>
    %33 = arith.select %31, %26, %32 : vector<128x128xi1>, vector<128x128xf32>
    %c1_i32_18 = arith.constant 1 : i32
    %34 = vector.broadcast %c1_i32_18 : i32 to vector<128x1xi32>
    %35 = arith.cmpi eq, %27, %34 : vector<128x1xi32>
    %cst_19 = arith.constant 0.000000e+00 : f32
    %36 = vector.shape_cast %35 : vector<128x1xi1> to vector<128x1xi1>
    %37 = vector.broadcast %36 : vector<128x1xi1> to vector<128x128xi1>
    %38 = vector.broadcast %cst_19 : f32 to vector<128x128xf32>
    %39 = arith.select %37, %26, %38 : vector<128x128xi1>, vector<128x128xf32>
    %c2_i32 = arith.constant 2 : i32
    %40 = vector.broadcast %c2_i32 : i32 to vector<128x1xi32>
    %41 = arith.cmpi eq, %27, %40 : vector<128x1xi32>
    %cst_20 = arith.constant 0.000000e+00 : f32
    %42 = vector.shape_cast %41 : vector<128x1xi1> to vector<128x1xi1>
    %43 = vector.broadcast %42 : vector<128x1xi1> to vector<128x128xi1>
    %44 = vector.broadcast %cst_20 : f32 to vector<128x128xf32>
    %45 = arith.select %43, %26, %44 : vector<128x128xi1>, vector<128x128xf32>
    %46 = tpu.concatenate %33, %39, %45 in 1 : vector<128x128xf32>, vector<128x128xf32>, vector<128x128xf32> -> vector<128x384xf32>
    %c0_21 = arith.constant 0 : index
    %c0_22 = arith.constant 0 : index
    %47 = vector.load %arg7[%c0_21, %c0_22] : memref<384x128xf32, #tpu.memory_space<vmem>>, vector<384x128xf32>
    %cst_23 = arith.constant dense<0.000000e+00> : vector<128x128xf32>
    %48 = tpu.matmul %46, %47, %cst_23 {dimension_numbers = #tpu.dot_dimension_numbers<[1], [0], [0], [1], [0, 0, 1, 1], [], []>} : vector<128x384xf32>, vector<384x128xf32>, vector<128x128xf32> -> vector<128x128xf32>
    %c0_24 = arith.constant 0 : index
    %c0_25 = arith.constant 0 : index
    %49 = vector.load %arg5[%c0_24, %c0_25] : memref<1x128xi32, #tpu.memory_space<vmem>>, vector<1x128xi32>
    %50 = vector.broadcast %49 : vector<1x128xi32> to vector<128x128xi32>
    %51 = arith.cmpi eq, %17, %50 : vector<128x128xi32>
    %cst_26 = arith.constant 1.000000e+00 : f32
    %cst_27 = arith.constant 0.000000e+00 : f32
    %52 = vector.broadcast %cst_26 : f32 to vector<128x128xf32>
    %53 = vector.broadcast %cst_27 : f32 to vector<128x128xf32>
    %54 = arith.select %51, %52, %53 : vector<128x128xi1>, vector<128x128xf32>
    %cst_28 = arith.constant dense<0.000000e+00> : vector<128x128xf32>
    %55 = tpu.matmul %54, %48, %cst_28 {dimension_numbers = #tpu.dot_dimension_numbers<[1], [0], [0], [1], [0, 0, 1, 1], [], []>} : vector<128x128xf32>, vector<128x128xf32>, vector<128x128xf32> -> vector<128x128xf32>
    %c0_29 = arith.constant 0 : index
    %c0_30 = arith.constant 0 : index
    %56 = vector.load %arg8[%c0_29, %c0_30] : memref<128x128xf32, #tpu.memory_space<vmem>>, vector<128x128xf32>
    tpu.vector_store %arg8[%c0_29, %c0_30], %55 {strides = array<i32>} : memref<128x128xf32, #tpu.memory_space<vmem>>, vector<128x128xf32>,
    return
  }
}

</mosaic_0001>

<bundles_post_ra>
// kernel: general_edge_hete_conv.1
= control target key start
LH: loop header
LB: loop body
LE: loop exit
PB: predicated region body
PF: predicated region fallthrough
CT: control target
= control target key end

     0   :  { %v2160_v0 = vmov 0   ;;  %s3212_s1 = inlined_call_operand.vmem [shape: s32[128,1], index: 1, kind: input, shape index: {}]   ;;  %s3213_s6 = inlined_call_operand.vmem [shape: f32[256,128], index: 6, kind: input, shape index: {}]   ;;  %s3214_s3 = inlined_call_operand.vmem [shape: s32[128,1], index: 3, kind: input, shape index: {}]   ;;  %s3215_s4 = inlined_call_operand.vmem [shape: s32[1,128], index: 4, kind: input, shape index: {}]   ;;  %s3216_s0 = inlined_call_operand.vmem [shape: f32[128,128], index: 0, kind: input, shape index: {}]   ;;  %s3217_s7 = inlined_call_operand.vmem [shape: f32[384,128], index: 7, kind: input, shape index: {}]   ;;  %s3218_s2 = inlined_call_operand.vmem [shape: f32[128,128], index: 2, kind: input, shape index: {}]   ;;  %s3219_s5 = inlined_call_operand.vmem [shape: s32[1,128], index: 5, kind: input, shape index: {}]   ;;  %s3220_s8 = inlined_call_operand.vmem [shape: f32[128,128], index: 8, kind: output, shape index: {}]  }
   0x1   :  { %2159 = vset.pattern.permute.xlu1 %v2160_v0  ;;  %2158 = vset.pattern.permute.xlu0 %v2160_v0  ;;  %v46_v1 = vld [vmem:[%s3212_s1 + $0x8] sm:$0xff]  ;;  %v45_v2 = vld [vmem:[%s3212_s1] sm:$0xff]  ;;  %v47_v5 = vld [vmem:[%s3212_s1 + $0x10] sm:$0xff] }
   0x2   :  { %vm174_vm0 = vcmp.eq.s32.totalorder %v46_v1, 1  ;;  %vm173_vm1 = vcmp.eq.s32.totalorder %v45_v2, 1  ;;  %vm62_vm2 = vcmp.eq.s32.totalorder %v46_v1, 0  ;;  %vm61_vm3 = vcmp.eq.s32.totalorder %v45_v2, 0  ;;  %v48_v8 = vld [vmem:[%s3212_s1 + $0x18] sm:$0xff]  ;;  %v49_v11 = vld [vmem:[%s3212_s1 + $0x20] sm:$0xff] }
   0x3   :  { %v190_v3 = vsel %vm174_vm0, 1, %v2160_v0  ;;  %v189_v4 = vsel %vm173_vm1, 1, %v2160_v0  ;;  %v78_v6 = vsel %vm62_vm2, 1, %v2160_v0  ;;  %v77_v7 = vsel %vm61_vm3, 1, %v2160_v0  ;;  %v316_v12 = vld [vmem:[%s3213_s6 + $0xf8] sm:$0xff]  ;;  %v315_v16 = vld [vmem:[%s3213_s6 + $0xf0] sm:$0xff] }
   0x4   :  { %209 = vperm.xlu1 %2159, %v190_v3   ;;  %206 = vperm.xlu0 %2158, %v189_v4   ;;  %vm63_vm4 = vcmp.eq.s32.totalorder %v47_v5, 0  ;;  %vm175_vm5 = vcmp.eq.s32.totalorder %v47_v5, 1  ;;  %vm64_vm6 = vcmp.eq.s32.totalorder %v48_v8, 0  ;;  %vm176_vm7 = vcmp.eq.s32.totalorder %v48_v8, 1  ;;  %v300_v13 = vld [vmem:[%s3213_s6 + $0x78] sm:$0xff]  ;;  %v299_v17 = vld [vmem:[%s3213_s6 + $0x70] sm:$0xff] }
   0x5   :  { %v79_v9 = vsel %vm63_vm4, 1, %v2160_v0  ;;  %v191_v10 = vsel %vm175_vm5, 1, %v2160_v0  ;;  %v80_v14 = vsel %vm64_vm6, 1, %v2160_v0  ;;  %v192_v15 = vsel %vm176_vm7, 1, %v2160_v0  ;;  %1699 = vmatprep.subr.mxu0 %v316_v12  ;;  %v50_v18 = vld [vmem:[%s3212_s1 + $0x28] sm:$0xff]  ;;  %v313_v23 = vld [vmem:[%s3213_s6 + $0xe0] sm:$0xff] }
   0x6   :  { %vm65_vm8 = vcmp.eq.s32.totalorder %v49_v11, 0  ;;  %vm177_vm9 = vcmp.eq.s32.totalorder %v49_v11, 1  ;;  %1700 = vmatpush3.msra.mxu0 %v300_v13  ;;  %v314_v19 = vld [vmem:[%s3213_s6 + $0xe8] sm:$0xff]  ;;  %vm66_vm10 = vcmp.eq.s32.totalorder %v50_v18, 0  ;;  %vm178_vm11 = vcmp.eq.s32.totalorder %v50_v18, 1  ;;  %v51_v24 = vld [vmem:[%s3212_s1 + $0x30] sm:$0xff] }
   0x7   :  { %1701 = vmatprep.subr.mxu0 %v315_v16  ;;  %v298_v20 = vld [vmem:[%s3213_s6 + $0x68] sm:$0xff]  ;;  %v81_v21 = vsel %vm65_vm8, 1, %v2160_v0  ;;  %v193_v22 = vsel %vm177_vm9, 1, %v2160_v0  ;;  %v297_v25 = vld [vmem:[%s3213_s6 + $0x60] sm:$0xff]  ;;  %v312_v26 = vld [vmem:[%s3213_s6 + $0xd8] sm:$0xff]  ;;  %v82_v27 = vsel %vm66_vm10, 1, %v2160_v0 }
   0x8   :  { %97 = vperm.xlu1 %2159, %v78_v6   ;;  %94 = vperm.xlu0 %2158, %v77_v7   ;;  %v194_v28 = vsel %vm178_vm11, 1, %v2160_v0  ;;  %vm67_vm12 = vcmp.eq.s32.totalorder %v51_v24, 0  ;;  %vm179_vm13 = vcmp.eq.s32.totalorder %v51_v24, 1  ;;  %v296_v29 = vld [vmem:[%s3213_s6 + $0x58] sm:$0xff]  ;;  %v311_v31 = vld [vmem:[%s3213_s6 + $0xd0] sm:$0xff]  ;;  %v310_v35 = vld [vmem:[%s3213_s6 + $0xc8] sm:$0xff] }
   0x9   :  { %1702 = vmatpush3.msra.mxu0 %v299_v17  ;;  %v52_v30 = vld [vmem:[%s3212_s1 + $0x38] sm:$0xff]  ;;  %v295_v32 = vld [vmem:[%s3213_s6 + $0x50] sm:$0xff]  ;;  %v83_v33 = vsel %vm67_vm12, 1, %v2160_v0  ;;  %v195_v34 = vsel %vm179_vm13, 1, %v2160_v0  ;;  %v53_v36 = vld [vmem:[%s3212_s1 + $0x40] sm:$0xff] }
   0xa   :  { %1703 = vmatprep.subr.mxu0 %v314_v19  ;;  %vm68_vm14 = vcmp.eq.s32.totalorder %v52_v30, 0  ;;  %vm180_vm15 = vcmp.eq.s32.totalorder %v52_v30, 1  ;;  %v294_v37 = vld [vmem:[%s3213_s6 + $0x48] sm:$0xff]  ;;  %v309_v38 = vld [vmem:[%s3213_s6 + $0xc0] sm:$0xff]  ;;  %vm69_vm0 = vcmp.eq.s32.totalorder %v53_v36, 0  ;;  %vm181_vm1 = vcmp.eq.s32.totalorder %v53_v36, 1 }
   0xb   :  { %1704 = vmatpush3.msra.mxu0 %v298_v20  ;;  %v84_v39 = vsel %vm68_vm14, 1, %v2160_v0  ;;  %v196_v40 = vsel %vm180_vm15, 1, %v2160_v0  ;;  %v293_v41 = vld [vmem:[%s3213_s6 + $0x40] sm:$0xff]  ;;  %v54_v42 = vld [vmem:[%s3212_s1 + $0x48] sm:$0xff]  ;;  %v308_v43 = vld [vmem:[%s3213_s6 + $0xb8] sm:$0xff]  ;;  %v85_v45 = vsel %vm69_vm0, 1, %v2160_v0 }
   0xc   :  { %100 = vperm.xlu1 %2159, %v79_v9   ;;  %212 = vperm.xlu0 %2158, %v191_v10   ;;  %v292_v44 = vld [vmem:[%s3213_s6 + $0x38] sm:$0xff]  ;;  %v197_v46 = vsel %vm181_vm1, 1, %v2160_v0  ;;  %vm70_vm2 = vcmp.eq.s32.totalorder %v54_v42, 0  ;;  %vm182_vm3 = vcmp.eq.s32.totalorder %v54_v42, 1  ;;  %v307_v47 = vld [vmem:[%s3213_s6 + $0xb0] sm:$0xff]  ;;  %v306_v50 = vld [vmem:[%s3213_s6 + $0xa8] sm:$0xff] }
   0xd   :  { %1705 = vmatprep.subr.mxu0 %v313_v23  ;;  %v55_v48 = vld [vmem:[%s3212_s1 + $0x50] sm:$0xff]  ;;  %v86_v51 = vsel %vm70_vm2, 1, %v2160_v0  ;;  %v198_v52 = vsel %vm182_vm3, 1, %v2160_v0  ;;  %v290_v53 = vld [vmem:[%s3213_s6 + $0x28] sm:$0xff]  ;;  %v56_v54 = vld [vmem:[%s3212_s1 + $0x58] sm:$0xff] }
   0xe   :  { %1706 = vmatpush3.msra.mxu0 %v297_v25  ;;  %v291_v49 = vld [vmem:[%s3213_s6 + $0x30] sm:$0xff]  ;;  %vm71_vm4 = vcmp.eq.s32.totalorder %v55_v48, 0  ;;  %vm183_vm5 = vcmp.eq.s32.totalorder %v55_v48, 1  ;;  %v305_v55 = vld [vmem:[%s3213_s6 + $0xa0] sm:$0xff]  ;;  %vm72_vm6 = vcmp.eq.s32.totalorder %v56_v54, 0  ;;  %vm184_vm7 = vcmp.eq.s32.totalorder %v56_v54, 1 }
   0xf   :  { %1707 = vmatprep.subr.mxu0 %v312_v26  ;;  %v289_v56 = vld [vmem:[%s3213_s6 + $0x20] sm:$0xff]  ;;  %v87_v57 = vsel %vm71_vm4, 1, %v2160_v0  ;;  %v199_v58 = vsel %vm183_vm5, 1, %v2160_v0  ;;  %v304_v59 = vld [vmem:[%s3213_s6 + $0x98] sm:$0xff]  ;;  %v303_v62 = vld [vmem:[%s3213_s6 + $0x90] sm:$0xff]  ;;  %v88_v63 = vsel %vm72_vm6, 1, %v2160_v0  ;;  %v462_v25 = vlaneseq }
  0x10   :  { %103 = vperm.xlu1 %2159, %v80_v14   ;;  %215 = vperm.xlu0 %2158, %v192_v15   ;;  %v57_v60 = vld [vmem:[%s3212_s1 + $0x60] sm:$0xff]  ;;  %v288_v61 = vld [vmem:[%s3213_s6 + $0x18] sm:$0xff]  ;;  %v200_v1 = vsel %vm184_vm7, 1, %v2160_v0  ;;  %v287_v2 = vld [vmem:[%s3213_s6 + $0x10] sm:$0xff] }
  0x11   :  { %1708 = vmatpush3.msra.mxu0 %v296_v29  ;;  %vm73_vm8 = vcmp.eq.s32.totalorder %v57_v60, 0  ;;  %vm185_vm9 = vcmp.eq.s32.totalorder %v57_v60, 1  ;;  %v58_v3 = vld [vmem:[%s3212_s1 + $0x68] sm:$0xff]  ;;  %v301_v8 = vld [vmem:[%s3213_s6 + $0x80] sm:$0xff]  ;;  %v59_v9 = vld [vmem:[%s3212_s1 + $0x70] sm:$0xff] }
  0x12   :  { %1709 = vmatprep.subr.mxu0 %v311_v31  ;;  %v302_v4 = vld [vmem:[%s3213_s6 + $0x88] sm:$0xff]  ;;  %v89_v6 = vsel %vm73_vm8, 1, %v2160_v0  ;;  %v201_v7 = vsel %vm185_vm9, 1, %v2160_v0  ;;  %vm74_vm10 = vcmp.eq.s32.totalorder %v58_v3, 0  ;;  %vm186_vm11 = vcmp.eq.s32.totalorder %v58_v3, 1  ;;  %v285_v10 = vld [vmem:[%s3213_s6] sm:$0xff] }
  0x13   :  { %1710 = vmatpush3.msra.mxu0 %v295_v32  ;;  %v286_v5 = vld [vmem:[%s3213_s6 + $0x8] sm:$0xff]  ;;  %v90_v11 = vsel %vm74_vm10, 1, %v2160_v0  ;;  %v202_v12 = vsel %vm186_vm11, 1, %v2160_v0  ;;  %vm75_vm12 = vcmp.eq.s32.totalorder %v59_v9, 0  ;;  %vm187_vm13 = vcmp.eq.s32.totalorder %v59_v9, 1  ;;  %v60_v13 = vld [vmem:[%s3212_s1 + $0x78] sm:$0xff] }
  0x14   :  { %106 = vperm.xlu1 %2159, %v81_v21   ;;  %218 = vperm.xlu0 %2158, %v193_v22   ;;  %v91_v14 = vsel %vm75_vm12, 1, %v2160_v0  ;;  %v203_v15 = vsel %vm187_vm13, 1, %v2160_v0  ;;  %vm76_vm14 = vcmp.eq.s32.totalorder %v60_v13, 0  ;;  %vm188_vm15 = vcmp.eq.s32.totalorder %v60_v13, 1  ;;  %v2387_v16 = vld [vmem:[%s3214_s3] sm:$0xff]  ;;  %v2397_v20 = vld [vmem:[%s3214_s3 + $0x8] sm:$0xff] }
  0x15   :  { %1711 = vmatprep.subr.mxu0 %v310_v35  ;;  %v92_v17 = vsel %vm76_vm14, 1, %v2160_v0  ;;  %v204_v18 = vsel %vm188_vm15, 1, %v2160_v0  ;;  %vm837_vm0 = vcmp.eq.s32.totalorder %v2387_v16, 1  ;;  %vm725_vm1 = vcmp.eq.s32.totalorder %v2387_v16, 0  ;;  %v2406_v23 = vld [vmem:[%s3214_s3 + $0x10] sm:$0xff]  ;;  %v2437_v35 = vld [vmem:[%s3214_s3 + $0x20] sm:$0xff] }
  0x16   :  { %1712 = vmatpush3.msra.mxu0 %v294_v37  ;;  %v853_v19 = vsel %vm837_vm0, 1, %v2160_v0  ;;  %v741_v21 = vsel %vm725_vm1, 1, %v2160_v0  ;;  %vm838_vm2 = vcmp.eq.s32.totalorder %v2397_v20, 1  ;;  %vm726_vm3 = vcmp.eq.s32.totalorder %v2397_v20, 0  ;;  %v2423_v30 = vld [vmem:[%s3215_s4] ss:$0 sm:$0xff] }
  0x17   :  { %1713 = vmatprep.subr.mxu0 %v309_v38  ;;  %v854_v22 = vsel %vm838_vm2, 1, %v2160_v0  ;;  %v742_v24 = vsel %vm726_vm3, 1, %v2160_v0  ;;  %vm839_vm4 = vcmp.eq.s32.totalorder %v2406_v23, 1  ;;  %vm727_vm5 = vcmp.eq.s32.totalorder %v2406_v23, 0  ;;  %v2458_v42 = vld [vmem:[%s3214_s3 + $0x28] sm:$0xff]  ;;  %v29_v3 = vld [vmem:[%s3216_s0] sm:$0xff] }
  0x18   :  { %109 = vperm.xlu1 %2159, %v82_v27   ;;  %221 = vperm.xlu0 %2158, %v194_v28   ;;  %v855_v26 = vsel %vm839_vm4, 1, %v2160_v0  ;;  %v2415_v27 = vld [vmem:[%s3214_s3 + $0x18] sm:$0xff]  ;;  %v2417_v28 = vshrl.u32 %v462_v25, 7  ;;  %v743_v29 = vsel %vm727_vm5, 1, %v2160_v0  ;;  %vm841_vm10 = vcmp.eq.s32.totalorder %v2437_v35, 1  ;;  %v2548_v13 = vld [vmem:[%s3214_s3 + $0x48] sm:$0xff] }
  0x19   :  { %1714 = vmatpush3.msra.mxu0 %v293_v41  ;;  %vm840_vm6 = vcmp.eq.s32.totalorder %v2415_v27, 1  ;;  %vm728_vm8 = vcmp.eq.s32.totalorder %v2415_v27, 0  ;;  %vm729_vm12 = vcmp.eq.s32.totalorder %v2437_v35, 0  ;;  %vm842_vm14 = vcmp.eq.s32.totalorder %v2458_v42, 1 }
  0x1a   :  { %1715 = vmatprep.subr.mxu0 %v308_v43  ;;  %vm484_vm7 = vcmp.eq.s32.totalorder %v2417_v28, %v2423_v30  ;;  %v2429_v31 = vadd.s32 8, %v2417_v28  ;;  %v856_v32 = vsel %vm840_vm6, 1, %v2160_v0  ;;  %v2442_v36 = vadd.s32 16, %v2417_v28 }
  0x1b   :  { %1716 = vmatpush3.msra.mxu0 %v292_v44  ;;  %v744_v37 = vsel %vm728_vm8, 1, %v2160_v0  ;;  %v2463_v43 = vadd.s32 32, %v2417_v28  ;;  %v745_v44 = vsel %vm729_vm12, 1, %v2160_v0  ;;  %vm730_vm0 = vcmp.eq.s32.totalorder %v2458_v42, 0 }
  0x1c   :  { %112 = vperm.xlu1 %2159, %v83_v33   ;;  %224 = vperm.xlu0 %2158, %v195_v34   ;;  %v2161_v33 = vmov 0.0   ;;  %vm485_vm9 = vcmp.eq.s32.totalorder %v2429_v31, %v2423_v30  ;;  %vm486_vm11 = vcmp.eq.s32.totalorder %v2442_v36, %v2423_v30  ;;  %v2513_v60 = vadd.s32 72, %v2417_v28 }
  0x1d   :  { %1717 = vmatprep.subr.mxu0 %v307_v47  ;;  %v500_v34 = vsel %vm484_vm7, 1.0, %v2161_v33  ;;  %v501_v38 = vsel %vm485_vm9, 1.0, %v2161_v33  ;;  %v502_v41 = vsel %vm486_vm11, 1.0, %v2161_v33  ;;  %vm488_vm15 = vcmp.eq.s32.totalorder %v2463_v43, %v2423_v30 }
  0x1e   :  { %1718 = vmatpush3.msra.mxu0 %v291_v49  ;;  %v858_v47 = vsel %vm842_vm14, 1, %v2160_v0  ;;  %v504_v48 = vsel %vm488_vm15, 1.0, %v2161_v33  ;;  %v2479_v49 = vld [vmem:[%s3214_s3 + $0x30] sm:$0xff]  ;;  %vm493_vm9 = vcmp.eq.s32.totalorder %v2513_v60, %v2423_v30 }
  0x1f   :  { %1719 = vmatprep.subr.mxu0 %v306_v50  ;;  %v2484_v50 = vadd.s32 48, %v2417_v28  ;;  %vm843_vm2 = vcmp.eq.s32.totalorder %v2479_v49, 1  ;;  %vm731_vm4 = vcmp.eq.s32.totalorder %v2479_v49, 0 }
  0x20   :  { %115 = vperm.xlu1 %2159, %v84_v39   ;;  %227 = vperm.xlu0 %2158, %v196_v40   ;;  %v2450_v39 = vadd.s32 24, %v2417_v28  ;;  %v857_v40 = vsel %vm841_vm10, 1, %v2160_v0  ;;  %v859_v54 = vsel %vm843_vm2, 1, %v2160_v0 }
  0x21   :  { %1720 = vmatpush3.msra.mxu0 %v290_v53  ;;  %3227 = vst [vmem:[#allocation2_spill] sm:$0xff] %v2484_v50  ;;  %vm490_vm3 = vcmp.eq.s32.totalorder %v2484_v50, %v2423_v30  ;;  %v2492_v53 = vadd.s32 56, %v2417_v28 }
  0x22   :  { %1721 = vmatprep.subr.mxu0 %v305_v55  ;;  %vm487_vm13 = vcmp.eq.s32.totalorder %v2450_v39, %v2423_v30  ;;  %v506_v55 = vsel %vm490_vm3, 1.0, %v2161_v33 }
  0x23   :  { %1722 = vmatpush3.msra.mxu0 %v289_v56  ;;  %3228 = vst [vmem:[#allocation3_spill] sm:$0xff] %v2492_v53  ;;  %v2500_v56 = vld [vmem:[%s3214_s3 + $0x38] sm:$0xff]  ;;  %vm491_vm5 = vcmp.eq.s32.totalorder %v2492_v53, %v2423_v30 }
  0x24   :  { %118 = vperm.xlu1 %2159, %v85_v45   ;;  %230 = vperm.xlu0 %2158, %v197_v46   ;;  %v503_v45 = vsel %vm487_vm13, 1.0, %v2161_v33  ;;  %v2471_v46 = vadd.s32 40, %v2417_v28  ;;  %vm844_vm6 = vcmp.eq.s32.totalorder %v2500_v56, 1  ;;  %vm732_vm8 = vcmp.eq.s32.totalorder %v2500_v56, 0 }
  0x25   :  { %1723 = vmatprep.subr.mxu0 %v304_v59  ;;  %v507_v59 = vsel %vm491_vm5, 1.0, %v2161_v33  ;;  %vm949_vm5 = vcmp.eq.s32.totalorder %v2387_v16, 2 }
  0x26   :  { %1724 = vmatpush3.msra.mxu0 %v288_v61  ;;  %vm489_vm1 = vcmp.eq.s32.totalorder %v2471_v46, %v2423_v30  ;;  %v860_v61 = vsel %vm844_vm6, 1, %v2160_v0  ;;  %v965_v16 = vsel %vm949_vm5, 1, %v2160_v0 }
  0x27   :  { %1725 = vmatprep.subr.mxu0 %v303_v62 }
  0x28   :  { %121 = vperm.xlu1 %2159, %v86_v51   ;;  %233 = vperm.xlu0 %2158, %v198_v52   ;;  %v746_v51 = vsel %vm730_vm0, 1, %v2160_v0  ;;  %v505_v52 = vsel %vm489_vm1, 1.0, %v2161_v33  ;;  %vm846_vm1 = vcmp.eq.s32.totalorder %v2548_v13, 1 }
  0x29   :  { %1726 = vmatpush3.msra.mxu0 %v287_v2  ;;  %v748_v2 = vsel %vm732_vm8, 1, %v2160_v0 }
  0x2a   :  { %1727 = vmatprep.subr.mxu0 %v302_v4 }
  0x2b   :  { %1728 = vmatpush3.msra.mxu0 %v286_v5 }
  0x2c   :  { %124 = vperm.xlu1 %2159, %v87_v57   ;;  %236 = vperm.xlu0 %2158, %v199_v58   ;;  %v2505_v57 = vadd.s32 64, %v2417_v28  ;;  %v747_v58 = vsel %vm731_vm4, 1, %v2160_v0 }
  0x2d   :  { %1729 = vmatprep.subr.mxu0 %v301_v8 }
  0x2e   :  { %1730 = vmatpush3.msra.mxu0 %v285_v10  ;;  %vm492_vm7 = vcmp.eq.s32.totalorder %v2505_v57, %v2423_v30 }
  0x2f   :  { %v508_v62 = vsel %vm492_vm7, 1.0, %v2161_v33 }
  0x30   :  { %127 = vperm.xlu1 %2159, %v88_v63   ;;  %239 = vperm.xlu0 %2158, %v200_v1   ;;  %v2521_v63 = vld [vmem:[%s3214_s3 + $0x40] sm:$0xff]  ;;  %v2526_v1 = vadd.s32 80, %v2417_v28 }
  0x31   :  { %vm845_vm10 = vcmp.eq.s32.totalorder %v2521_v63, 1  ;;  %vm733_vm13 = vcmp.eq.s32.totalorder %v2521_v63, 0 }
  0x32   :  { %vm494_vm12 = vcmp.eq.s32.totalorder %v2526_v1, %v2423_v30  ;;  %v861_v8 = vsel %vm845_vm10, 1, %v2160_v0 }
  0x34   :  { %130 = vperm.xlu1 %2159, %v89_v6   ;;  %242 = vperm.xlu0 %2158, %v201_v7   ;;  %v509_v6 = vsel %vm493_vm9, 1.0, %v2161_v33  ;;  %v2537_v7 = vadd.s32 88, %v2417_v28  ;;  %vm734_vm9 = vcmp.eq.s32.totalorder %v2548_v13, 0 }
  0x36   :  { %vm495_vm0 = vcmp.eq.s32.totalorder %v2537_v7, %v2423_v30 }
  0x38   :  { %133 = vperm.xlu1 %2159, %v90_v11   ;;  %245 = vperm.xlu0 %2158, %v202_v12   ;;  %v510_v11 = vsel %vm494_vm12, 1.0, %v2161_v33  ;;  %v30_v12 = vld [vmem:[%s3216_s0 + $0x8] sm:$0xff] }
  0x3c   :  { %136 = vperm.xlu1 %2159, %v91_v14   ;;  %248 = vperm.xlu0 %2158, %v203_v15   ;;  %v2553_v14 = vadd.s32 96, %v2417_v28  ;;  %v749_v15 = vsel %vm733_vm13, 1, %v2160_v0  ;;  %vm950_vm13 = vcmp.eq.s32.totalorder %v2397_v20, 2 }
  0x3d   :  { %v966_v20 = vsel %vm950_vm13, 1, %v2160_v0  ;;  %vm953_vm13 = vcmp.eq.s32.totalorder %v2437_v35, 2  ;;  %v40_v35 = vld [vmem:[%s3216_s0 + $0x58] sm:$0xff] }
  0x3e   :  { %vm496_vm4 = vcmp.eq.s32.totalorder %v2553_v14, %v2423_v30 }
  0x40   :  { %139 = vperm.xlu1 %2159, %v92_v17   ;;  %251 = vperm.xlu0 %2158, %v204_v18  }
  0x44   :  { %870 = vperm.xlu1 %2159, %v853_v19   ;;  %v511_v19 = vsel %vm495_vm0, 1.0, %v2161_v33 }
  0x48   :  { %758 = vperm.xlu1 %2159, %v741_v21   ;;  %v31_v21 = vld [vmem:[%s3216_s0 + $0x10] sm:$0xff] }
  0x4c   :  { %873 = vperm.xlu1 %2159, %v854_v22   ;;  %v2564_v22 = vadd.s32 104, %v2417_v28 }
  0x4e   :  { %vm497_vm8 = vcmp.eq.s32.totalorder %v2564_v22, %v2423_v30 }
  0x50   :  { %761 = vperm.xlu1 %2159, %v742_v24   ;;  %v862_v24 = vsel %vm846_vm1, 1, %v2160_v0 }
  0x54   :  { %876 = vperm.xlu1 %2159, %v855_v26  }
  0x58   :  { %764 = vperm.xlu1 %2159, %v743_v29   ;;  %v512_v29 = vsel %vm496_vm4, 1.0, %v2161_v33 }
  0x5c   :  { %879 = vperm.xlu1 %2159, %v856_v32   ;;  %v32_v32 = vld [vmem:[%s3216_s0 + $0x18] sm:$0xff] }
  0x5e   :  { %532 = vxpose.xlu0.b32.start [1/16] %v500_v34, 128  ;;  %v2575_v34 = vadd.s32 112, %v2417_v28 }
  0x60   :  { %767 = vperm.xlu1 %2159, %v744_v37   ;;  %3229 = vst [vmem:[#allocation4_spill] sm:$0xff] %v2575_v34  ;;  %vm498_vm12 = vcmp.eq.s32.totalorder %v2575_v34, %v2423_v30 }
  0x62   :  { %533 = vxpose.xlu0.b32.cont [2/16] %v501_v38, 128 }
  0x64   :  { %882 = vperm.xlu1 %2159, %v857_v40   ;;  %v513_v40 = vsel %vm497_vm8, 1.0, %v2161_v33 }
  0x66   :  { %534 = vxpose.xlu0.b32.cont [3/16] %v502_v41, 128  ;;  %v33_v41 = vld [vmem:[%s3216_s0 + $0x20] sm:$0xff] }
  0x68   :  { %770 = vperm.xlu1 %2159, %v745_v44   ;;  %v2586_v44 = vadd.s32 120, %v2417_v28 }
  0x6a   :  { %535 = vxpose.xlu0.b32.cont [4/16] %v503_v45, 128  ;;  %3230 = vst [vmem:[#allocation5_spill] sm:$0xff] %v2586_v44  ;;  %v750_v45 = vsel %vm734_vm9, 1, %v2160_v0  ;;  %vm499_vm0 = vcmp.eq.s32.totalorder %v2586_v44, %v2423_v30 }
  0x6c   :  { %885 = vperm.xlu1 %2159, %v858_v47  }
  0x6e   :  { %536 = vxpose.xlu0.b32.cont [5/16] %v504_v48, 128 }
  0x70   :  { %773 = vperm.xlu1 %2159, %v746_v51   ;;  %v514_v51 = vsel %vm498_vm12, 1.0, %v2161_v33 }
  0x72   :  { %537 = vxpose.xlu0.b32.cont [6/16] %v505_v52, 128  ;;  %v34_v52 = vld [vmem:[%s3216_s0 + $0x28] sm:$0xff] }
  0x74   :  { %888 = vperm.xlu1 %2159, %v859_v54   ;;  %v2597_v54 = vld [vmem:[%s3214_s3 + $0x50] sm:$0xff] }
  0x75   :  { %vm847_vm1 = vcmp.eq.s32.totalorder %v2597_v54, 1  ;;  %vm735_vm4 = vcmp.eq.s32.totalorder %v2597_v54, 0 }
  0x76   :  { %538 = vxpose.xlu0.b32.cont [7/16] %v506_v55, 128  ;;  %v863_v30 = vsel %vm847_vm1, 1, %v2160_v0 }
  0x78   :  { %776 = vperm.xlu1 %2159, %v747_v58  }
  0x7a   :  { %539 = vxpose.xlu0.b32.cont [8/16] %v507_v59, 128  ;;  %v515_v59 = vsel %vm499_vm0, 1.0, %v2161_v33  ;;  %v36_v33 = vld [vmem:[%s3216_s0 + $0x38] sm:$0xff] }
  0x7c   :  { %891 = vperm.xlu1 %2159, %v860_v61   ;;  %v35_v61 = vld [vmem:[%s3216_s0 + $0x30] sm:$0xff] }
  0x7e   :  { %540 = vxpose.xlu0.b32.cont [9/16] %v508_v62, 128 }
  0x7f   :  { %v210_v4 = vpop.permute.xlu1 %209  ;;  %v207_v5 = vpop.permute.xlu0 %206 }
  0x80   :  { %779 = vperm.xlu1 %2159, %v748_v2   ;;  %vm253_vm11 = vcmp.eq.s32.totalorder %v207_v5, 1  ;;  %vm254_vm14 = vcmp.eq.s32.totalorder %v210_v4, 1 }
  0x81   :  { %1601 = vmatprep.mubr.msk.f32.mxu0 %vm253_vm11, %v29_v3 }
  0x82   :  { %541 = vxpose.xlu0.b32.cont [10/16] %v509_v6, 128  ;;  %v37_v6 = vld [vmem:[%s3216_s0 + $0x40] sm:$0xff] }
  0x83   :  { %v98_v9 = vpop.permute.xlu1 %97  ;;  %v95_v10 = vpop.permute.xlu0 %94 }
  0x84   :  { %vm141_vm15 = vcmp.eq.s32.totalorder %v95_v10, 1  ;;  %894 = vperm.xlu1 %2159, %v861_v8   ;;  %vm142_vm2 = vcmp.eq.s32.totalorder %v98_v9, 1  ;;  %v2620_v8 = vld [vmem:[%s3214_s3 + $0x58] sm:$0xff] }
  0x85   :  { %1602 = vmatmul.mubr.msk.f32.vlgmr.msra.gmra.mxu0 %vm141_vm15, %v29_v3  ;;  %v751_v3 = vsel %vm735_vm4, 1, %v2160_v0  ;;  %vm736_vm0 = vcmp.eq.s32.totalorder %v2620_v8, 0 }
  0x86   :  { %542 = vxpose.xlu0.b32.cont [11/16] %v510_v11, 128  ;;  %1603 = vmatprep.mubr.msk.f32.mxu0 %vm254_vm14, %v30_v12  ;;  %v38_v11 = vld [vmem:[%s3216_s0 + $0x48] sm:$0xff] }
  0x87   :  { %v101_v17 = vpop.permute.xlu1 %100  ;;  %v213_v18 = vpop.permute.xlu0 %212 }
  0x88   :  { %vm255_vm3 = vcmp.eq.s32.totalorder %v213_v18, 1  ;;  %782 = vperm.xlu1 %2159, %v749_v15   ;;  %vm143_vm6 = vcmp.eq.s32.totalorder %v101_v17, 1  ;;  %v39_v18 = vld [vmem:[%s3216_s0 + $0x50] sm:$0xff] }
  0x89   :  { %1604 = vmatmul.mubr.msk.f32.gmra.mxu0 %vm142_vm2, %v30_v12 }
  0x8a   :  { %543 = vxpose.xlu0.b32.cont [12/16] %v511_v19, 128  ;;  %1605 = vmatprep.mubr.msk.f32.mxu0 %vm255_vm3, %v31_v21  ;;  %v969_v19 = vsel %vm953_vm13, 1, %v2160_v0 }
  0x8b   :  { %v104_v25 = vpop.permute.xlu1 %103  ;;  %v216_v26 = vpop.permute.xlu0 %215 }
  0x8c   :  { %vm256_vm7 = vcmp.eq.s32.totalorder %v216_v26, 1  ;;  %897 = vperm.xlu1 %2159, %v862_v24   ;;  %vm144_vm10 = vcmp.eq.s32.totalorder %v104_v25, 1  ;;  %v752_v25 = vsel %vm736_vm0, 1, %v2160_v0  ;;  %vm956_vm0 = vcmp.eq.s32.totalorder %v2500_v56, 2 }
  0x8d   :  { %1606 = vmatmul.mubr.msk.f32.gmra.mxu0 %vm143_vm6, %v31_v21 }
  0x8e   :  { %544 = vxpose.xlu0.b32.cont [13/16] %v512_v29, 128  ;;  %1607 = vmatprep.mubr.msk.f32.mxu0 %vm256_vm7, %v32_v32  ;;  %vm952_vm7 = vcmp.eq.s32.totalorder %v2415_v27, 2 }
  0x8f   :  { %v107_v37 = vpop.permute.xlu1 %106  ;;  %v219_v38 = vpop.permute.xlu0 %218  ;;  %v968_v9 = vsel %vm952_vm7, 1, %v2160_v0 }
  0x90   :  { %vm257_vm11 = vcmp.eq.s32.totalorder %v219_v38, 1  ;;  %982 = vperm.xlu1 %2159, %v965_v16   ;;  %vm145_vm14 = vcmp.eq.s32.totalorder %v107_v37, 1  ;;  %v2645_v16 = vld [vmem:[%s3214_s3 + $0x60] sm:$0xff] }
  0x91   :  { %1608 = vmatmul.mubr.msk.f32.gmra.mxu0 %vm144_vm10, %v32_v32  ;;  %vm848_vm10 = vcmp.eq.s32.totalorder %v2620_v8, 1  ;;  %v41_v32 = vld [vmem:[%s3216_s0 + $0x60] sm:$0xff] }
  0x92   :  { %545 = vxpose.xlu0.b32.cont [14/16] %v513_v40, 128  ;;  %1609 = vmatprep.mubr.msk.f32.mxu0 %vm257_vm11, %v33_v41  ;;  %v864_v12 = vsel %vm848_vm10, 1, %v2160_v0  ;;  %v42_v40 = vld [vmem:[%s3216_s0 + $0x68] sm:$0xff] }
  0x93   :  { %v110_v47 = vpop.permute.xlu1 %109  ;;  %v222_v48 = vpop.permute.xlu0 %221 }
  0x94   :  { %vm258_vm15 = vcmp.eq.s32.totalorder %v222_v48, 1  ;;  %785 = vperm.xlu1 %2159, %v750_v45   ;;  %vm146_vm2 = vcmp.eq.s32.totalorder %v110_v47, 1  ;;  %v43_v48 = vld [vmem:[%s3216_s0 + $0x70] sm:$0xff] }
  0x95   :  { %1610 = vmatmul.mubr.msk.f32.gmra.mxu0 %vm145_vm14, %v33_v41 }
  0x96   :  { %546 = vxpose.xlu0.b32.cont [15/16] %v514_v51, 128  ;;  %1611 = vmatprep.mubr.msk.f32.mxu0 %vm258_vm15, %v34_v52 }
  0x97   :  { %v113_v55 = vpop.permute.xlu1 %112  ;;  %v225_v58 = vpop.permute.xlu0 %224 }
  0x98   :  { %vm259_vm3 = vcmp.eq.s32.totalorder %v225_v58, 1  ;;  %985 = vperm.xlu1 %2159, %v966_v20   ;;  %vm147_vm5 = vcmp.eq.s32.totalorder %v113_v55, 1  ;;  %v722_v58 = vld [vmem:[%s3214_s3 + $0x68] sm:$0xff] }
  0x99   :  { %1612 = vmatmul.mubr.msk.f32.gmra.mxu0 %vm146_vm2, %v34_v52 }
  0x9a   :  { %547 = vxpose.xlu0.b32.end [16/16] %v515_v59, 128  ;;  %1613 = vmatprep.mubr.msk.f32.mxu0 %vm259_vm3, %v35_v61  ;;  %vm954_vm3 = vcmp.eq.s32.totalorder %v2458_v42, 2 }
  0x9b   :  { %v116_v62 = vpop.permute.xlu1 %115  ;;  %v228_v2 = vpop.permute.xlu0 %227  ;;  %v970_v37 = vsel %vm954_vm3, 1, %v2160_v0  ;;  %vm957_vm3 = vcmp.eq.s32.totalorder %v2521_v63, 2 }
  0x9c   :  { %vm260_vm6 = vcmp.eq.s32.totalorder %v228_v2, 1  ;;  %900 = vperm.xlu1 %2159, %v863_v30   ;;  %vm148_vm8 = vcmp.eq.s32.totalorder %v116_v62, 1  ;;  %v973_v56 = vsel %vm957_vm3, 1, %v2160_v0  ;;  %v723_v30 = vld [vmem:[%s3214_s3 + $0x70] sm:$0xff] }
  0x9d   :  { %1614 = vmatmul.mubr.msk.f32.gmra.mxu0 %vm147_vm5, %v35_v61  ;;  %v972_v61 = vsel %vm956_vm0, 1, %v2160_v0 }
  0x9e   :  { %1615 = vmatprep.mubr.msk.f32.mxu0 %vm260_vm6, %v36_v33  ;;  %vm849_vm6 = vcmp.eq.s32.totalorder %v2645_v16, 1 }
  0x9f   :  { %v119_v4 = vpop.permute.xlu1 %118  ;;  %v231_v5 = vpop.permute.xlu0 %230  ;;  %v865_v41 = vsel %vm849_vm6, 1, %v2160_v0  ;;  %vm851_vm6 = vcmp.eq.s32.totalorder %v723_v30, 1 }
  0xa0   :  { %vm261_vm9 = vcmp.eq.s32.totalorder %v231_v5, 1  ;;  %788 = vperm.xlu1 %2159, %v751_v3   ;;  %vm149_vm11 = vcmp.eq.s32.totalorder %v119_v4, 1  ;;  %v867_v63 = vsel %vm851_vm6, 1, %v2160_v0 }
  0xa1   :  { %1616 = vmatmul.mubr.msk.f32.gmra.mxu0 %vm148_vm8, %v36_v33 }
  0xa2   :  { %1617 = vmatprep.mubr.msk.f32.mxu0 %vm261_vm9, %v37_v6  ;;  %vm955_vm9 = vcmp.eq.s32.totalorder %v2479_v49, 2  ;;  %v44_v49 = vld [vmem:[%s3216_s0 + $0x78] sm:$0xff] }
  0xa3   :  { %v122_v27 = vpop.permute.xlu1 %121  ;;  %v234_v10 = vpop.permute.xlu0 %233  ;;  %v971_v51 = vsel %vm955_vm9, 1, %v2160_v0  ;;  %vm960_vm9 = vcmp.eq.s32.totalorder %v2620_v8, 2 }
  0xa4   :  { %vm262_vm12 = vcmp.eq.s32.totalorder %v234_v10, 1  ;;  %991 = vperm.xlu1 %2159, %v968_v9   ;;  %vm150_vm14 = vcmp.eq.s32.totalorder %v122_v27, 1  ;;  %v976_v4 = vsel %vm960_vm9, 1, %v2160_v0 }
  0xa5   :  { %1618 = vmatmul.mubr.msk.f32.gmra.mxu0 %vm149_vm11, %v37_v6 }
  0xa6   :  { %1619 = vmatprep.mubr.msk.f32.mxu0 %vm262_vm12, %v38_v11  ;;  %vm737_vm12 = vcmp.eq.s32.totalorder %v2645_v16, 0 }
  0xa7   :  { %v125_v15 = vpop.permute.xlu1 %124  ;;  %v237_v17 = vpop.permute.xlu0 %236  ;;  %v753_v55 = vsel %vm737_vm12, 1, %v2160_v0 }
  0xa8   :  { %vm263_vm15 = vcmp.eq.s32.totalorder %v237_v17, 1  ;;  %903 = vperm.xlu1 %2159, %v864_v12   ;;  %vm151_vm1 = vcmp.eq.s32.totalorder %v125_v15, 1  ;;  %v1107_v12 = vld [vmem:[%s3217_s7 + $0x170] sm:$0xff]  ;;  %v1106_v17 = vld [vmem:[%s3217_s7 + $0x168] sm:$0xff] }
  0xa9   :  { %1620 = vmatmul.mubr.msk.f32.gmra.mxu0 %vm150_vm14, %v38_v11  ;;  %v1108_v11 = vld [vmem:[%s3217_s7 + $0x178] sm:$0xff] }
  0xaa   :  { %1621 = vmatprep.mubr.msk.f32.mxu0 %vm263_vm15, %v39_v18  ;;  %vm951_vm15 = vcmp.eq.s32.totalorder %v2406_v23, 2  ;;  %2011 = vmatprep.subr.mxu0 %v1108_v11 }
  0xab   :  { %v128_v21 = vpop.permute.xlu1 %127  ;;  %v240_v24 = vpop.permute.xlu0 %239  ;;  %v967_v59 = vsel %vm951_vm15, 1, %v2160_v0  ;;  %2012 = vmatpush3.msra.mxu0 %v1108_v11 }
  0xac   :  { %vm264_vm2 = vcmp.eq.s32.totalorder %v240_v24, 1  ;;  %994 = vperm.xlu1 %2159, %v969_v19   ;;  %vm152_vm4 = vcmp.eq.s32.totalorder %v128_v21, 1  ;;  %2013 = vmatprep.subr.mxu0 %v1107_v12  ;;  %v1104_v24 = vld [vmem:[%s3217_s7 + $0x158] sm:$0xff] }
  0xad   :  { %1622 = vmatmul.mubr.msk.f32.gmra.mxu0 %vm151_vm1, %v39_v18 }
  0xae   :  { %1623 = vmatprep.mubr.msk.f32.mxu0 %vm264_vm2, %v40_v35  ;;  %vm850_vm2 = vcmp.eq.s32.totalorder %v722_v58, 1  ;;  %2014 = vmatpush3.msra.mxu0 %v1107_v12 }
  0xaf   :  { %v131_v26 = vpop.permute.xlu1 %130  ;;  %v243_v29 = vpop.permute.xlu0 %242  ;;  %v866_v23 = vsel %vm850_vm2, 1, %v2160_v0  ;;  %2015 = vmatprep.subr.mxu0 %v1106_v17 }
  0xb0   :  { %vm265_vm5 = vcmp.eq.s32.totalorder %v243_v29, 1  ;;  %791 = vperm.xlu1 %2159, %v752_v25   ;;  %vm153_vm7 = vcmp.eq.s32.totalorder %v131_v26, 1  ;;  %2016 = vmatpush3.msra.mxu0 %v1106_v17  ;;  %v1103_v25 = vld [vmem:[%s3217_s7 + $0x150] sm:$0xff] }
  0xb1   :  { %1624 = vmatmul.mubr.msk.f32.gmra.mxu0 %vm152_vm4, %v40_v35  ;;  %vm738_vm4 = vcmp.eq.s32.totalorder %v722_v58, 0 }
  0xb2   :  { %1625 = vmatprep.mubr.msk.f32.mxu0 %vm265_vm5, %v41_v32  ;;  %vm958_vm5 = vcmp.eq.s32.totalorder %v2548_v13, 2  ;;  %v754_v62 = vsel %vm738_vm4, 1, %v2160_v0  ;;  %v724_v13 = vld [vmem:[%s3214_s3 + $0x78] sm:$0xff] }
  0xb3   :  { %v134_v42 = vpop.permute.xlu1 %133  ;;  %v246_v38 = vpop.permute.xlu0 %245  ;;  %v974_v2 = vsel %vm958_vm5, 1, %v2160_v0  ;;  %vm740_vm12 = vcmp.eq.s32.totalorder %v724_v13, 0  ;;  %vm964_vm15 = vcmp.eq.s32.totalorder %v724_v13, 2 }
  0xb4   :  { %vm266_vm8 = vcmp.eq.s32.totalorder %v246_v38, 1  ;;  %997 = vperm.xlu1 %2159, %v970_v37   ;;  %vm154_vm10 = vcmp.eq.s32.totalorder %v134_v42, 1  ;;  %v756_v6 = vsel %vm740_vm12, 1, %v2160_v0  ;;  %v980_v10 = vsel %vm964_vm15, 1, %v2160_v0  ;;  %v1101_v37 = vld [vmem:[%s3217_s7 + $0x140] sm:$0xff] }
  0xb5   :  { %1626 = vmatmul.mubr.msk.f32.gmra.mxu0 %vm153_vm7, %v41_v32  ;;  %vm959_vm7 = vcmp.eq.s32.totalorder %v2597_v54, 2  ;;  %v1102_v32 = vld [vmem:[%s3217_s7 + $0x148] sm:$0xff] }
  0xb6   :  { %1627 = vmatprep.mubr.msk.f32.mxu0 %vm266_vm8, %v42_v40  ;;  %v975_v33 = vsel %vm959_vm7, 1, %v2160_v0  ;;  %vm739_vm8 = vcmp.eq.s32.totalorder %v723_v30, 0 }
  0xb7   :  { %v137_v45 = vpop.permute.xlu1 %136  ;;  %v249_v47 = vpop.permute.xlu0 %248  ;;  %v755_v3 = vsel %vm739_vm8, 1, %v2160_v0 }
  0xb8   :  { %vm267_vm11 = vcmp.eq.s32.totalorder %v249_v47, 1  ;;  %906 = vperm.xlu1 %2159, %v865_v41   ;;  %vm155_vm13 = vcmp.eq.s32.totalorder %v137_v45, 1  ;;  %v1099_v45 = vld [vmem:[%s3217_s7 + $0x130] sm:$0xff] }
  0xb9   :  { %1628 = vmatmul.mubr.msk.f32.gmra.mxu0 %vm154_vm10, %v42_v40  ;;  %vm852_vm10 = vcmp.eq.s32.totalorder %v724_v13, 1  ;;  %v1100_v40 = vld [vmem:[%s3217_s7 + $0x138] sm:$0xff] }
  0xba   :  { %1629 = vmatprep.mubr.msk.f32.mxu0 %vm267_vm11, %v43_v48  ;;  %vm961_vm11 = vcmp.eq.s32.totalorder %v2645_v16, 2  ;;  %v868_v54 = vsel %vm852_vm10, 1, %v2160_v0 }
  0xbb   :  { %v252_v52 = vpop.permute.xlu0 %251  ;;  %v140_v20 = vpop.permute.xlu1 %139  ;;  %v977_v5 = vsel %vm961_vm11, 1, %v2160_v0 }
  0xbc   :  { %vm268_vm14 = vcmp.eq.s32.totalorder %v252_v52, 1  ;;  %1000 = vperm.xlu1 %2159, %v971_v51   ;;  %vm156_vm1 = vcmp.eq.s32.totalorder %v140_v20, 1  ;;  %v1098_v51 = vld [vmem:[%s3217_s7 + $0x128] sm:$0xff] }
  0xbd   :  { %1630 = vmatmul.mubr.msk.f32.gmra.mxu0 %vm155_vm13, %v43_v48  ;;  %vm962_vm13 = vcmp.eq.s32.totalorder %v722_v58, 2  ;;  %v1096_v58 = vld [vmem:[%s3217_s7 + $0x118] sm:$0xff] }
  0xbe   :  { %1631 = vmatprep.mubr.msk.f32.mxu0 %vm268_vm14, %v44_v49  ;;  %v978_v8 = vsel %vm962_vm13, 1, %v2160_v0  ;;  %vm963_vm14 = vcmp.eq.s32.totalorder %v723_v30, 2 }
  0xbf   :  { %v979_v27 = vsel %vm963_vm14, 1, %v2160_v0  ;;  %v1105_v0 = vld [vmem:[%s3217_s7 + $0x160] sm:$0xff] }
  0xc0   :  { %794 = vperm.xlu1 %2159, %v753_v55   ;;  %2017 = vmatprep.subr.mxu0 %v1105_v0 }
  0xc1   :  { %1632 = vmatmul.mubr.msk.f32.gmra.mxu0 %vm156_vm1, %v44_v49  ;;  %v1097_v49 = vld [vmem:[%s3217_s7 + $0x120] sm:$0xff] }
  0xc2   :  { %2018 = vmatpush3.msra.mxu0 %v1105_v0 }
  0xc3   :  { %988 = vperm.xlu0 %2158, %v967_v59   ;;  %2019 = vmatprep.subr.mxu0 %v1104_v24 }
  0xc4   :  { %1003 = vperm.xlu1 %2159, %v972_v61   ;;  %2020 = vmatpush3.msra.mxu0 %v1104_v24 }
  0xc5   :  { %2021 = vmatprep.subr.mxu0 %v1103_v25 }
  0xc6   :  { %2022 = vmatpush3.msra.mxu0 %v1103_v25 }
  0xc7   :  { %909 = vperm.xlu0 %2158, %v866_v23   ;;  %2023 = vmatprep.subr.mxu0 %v1102_v32 }
  0xc8   :  { %1006 = vperm.xlu1 %2159, %v973_v56   ;;  %2024 = vmatpush3.msra.mxu0 %v1102_v32 }
  0xc9   :  { %2025 = vmatprep.subr.mxu0 %v1101_v37 }
  0xca   :  { %2026 = vmatpush3.msra.mxu0 %v1101_v37 }
  0xcb   :  { %797 = vperm.xlu0 %2158, %v754_v62   ;;  %2027 = vmatprep.subr.mxu0 %v1100_v40 }
  0xcc   :  { %1009 = vperm.xlu1 %2159, %v974_v2   ;;  %2028 = vmatpush3.msra.mxu0 %v1100_v40 }
  0xcd   :  { %2029 = vmatprep.subr.mxu0 %v1099_v45 }
  0xce   :  { %2030 = vmatpush3.msra.mxu0 %v1099_v45 }
  0xcf   :  { %912 = vperm.xlu0 %2158, %v867_v63   ;;  %2031 = vmatprep.subr.mxu0 %v1098_v51 }
  0xd0   :  { %1012 = vperm.xlu1 %2159, %v975_v33   ;;  %2032 = vmatpush3.msra.mxu0 %v1098_v51 }
  0xd1   :  { %2033 = vmatprep.subr.mxu0 %v1097_v49 }
  0xd2   :  { %2034 = vmatpush3.msra.mxu0 %v1097_v49  ;;  %v2761_v49 = vpop.permute.xlu1 %870 }
  0xd3   :  { %800 = vperm.xlu0 %2158, %v755_v3   ;;  %2035 = vmatprep.subr.mxu0 %v1096_v58  ;;  %vm917_vm0 = vcmp.eq.s32.totalorder %v2761_v49, 1 }
  0xd4   :  { %1015 = vperm.xlu1 %2159, %v976_v4   ;;  %2036 = vmatpush3.msra.mxu0 %v1096_v58 }
  0xd7   :  { %915 = vperm.xlu0 %2158, %v868_v54  }
  0xd8   :  { %1018 = vperm.xlu1 %2159, %v977_v5  }
  0xda   :  { %v548_v9 = vpop.trf.xlu0 }
  0xdb   :  { %803 = vperm.xlu0 %2158, %v756_v6   ;;  %1987 = vmatprep.mubr.f32.mxu1 %v548_v9 }
  0xdc   :  { %1021 = vperm.xlu1 %2159, %v978_v8  }
  0xde   :  { %v2746_v13 = vpop.trf.xlu0 }
  0xdf   :  { %1024 = vperm.xlu0 %2158, %v979_v27  }
  0xe0   :  { %1027 = vperm.xlu1 %2159, %v980_v10  }
  0xe2   :  { %v2748_v5 = vpop.trf.xlu0 }
  0xe6   :  { %v2750_v27 = vpop.trf.xlu0 }
 0x145   :  { %v1731_v15 = vpop.f32.mrf.mxu0 }
 0x147   :  { %v1732_v18 = vpop.f32.mrf.mxu0 }
 0x148   :  { %v2707_v19 = vadd.f32 %v1732_v18, %v1731_v15  ;;  %v2752_v15 = vpop.trf.xlu0 }
 0x149   :  { %v1734_v21 = vpop.f32.mrf.mxu0 }
 0x14b   :  { %v1735_v35 = vpop.f32.mrf.mxu0 }
 0x14c   :  { %v2715_v26 = vadd.f32 %v1735_v35, %v1734_v21  ;;  %v2754_v24 = vpop.trf.xlu0 }
 0x14d   :  { %v1737_v29 = vpop.f32.mrf.mxu0 }
 0x14f   :  { %v1738_v16 = vpop.f32.mrf.mxu0 }
 0x150   :  { %v2723_v42 = vadd.f32 %v1738_v16, %v1737_v29  ;;  %v2756_v32 = vpop.trf.xlu0 }
 0x151   :  { %v1740_v38 = vpop.f32.mrf.mxu0 }
 0x153   :  { %v1741_v41 = vpop.f32.mrf.mxu0 }
 0x154   :  { %v2731_v47 = vadd.f32 %v1741_v41, %v1740_v38  ;;  %v2758_v40 = vpop.trf.xlu0 }
 0x155   :  { %v1743_v48 = vpop.f32.mrf.mxu0 }
 0x157   :  { %v1744_v52 = vpop.f32.mrf.mxu0 }
 0x158   :  { %v2739_v20 = vadd.f32 %v1744_v52, %v1743_v48  ;;  %v556_v51 = vpop.trf.xlu0 }
 0x159   :  { %v2741_v55 = vpop.f32.mrf.mxu0 }
 0x15b   :  { %v1747_v59 = vpop.f32.mrf.mxu0 }
 0x15c   :  { %v1748_v52 = vadd.f32 %v1747_v59, %v2741_v55  ;;  %v557_v58 = vpop.trf.xlu0  ;;  %v1092_v59 = vld [vmem:[%s3217_s7 + $0xf8] sm:$0xff] }
 0x15d   :  { %v1749_v61 = vpop.f32.mrf.mxu0 }
 0x15f   :  { %v1750_v23 = vpop.f32.mrf.mxu0 }
 0x160   :  { %v1751_v48 = vadd.f32 %v1750_v23, %v1749_v61  ;;  %v2767_v61 = vpop.permute.xlu1 %758  ;;  %v558_v55 = vpop.trf.xlu0  ;;  %v1074_v23 = vld [vmem:[%s3217_s7 + $0x68] sm:$0xff] }
 0x161   :  { %v1752_v56 = vpop.f32.mrf.mxu0  ;;  %vm805_vm2 = vcmp.eq.s32.totalorder %v2767_v61, 1 }
 0x163   :  { %v1753_v30 = vpop.f32.mrf.mxu0 }
 0x164   :  { %v1754_v45 = vadd.f32 %v1753_v30, %v1752_v56  ;;  %v559_v56 = vpop.trf.xlu0  ;;  %v1089_v30 = vld [vmem:[%s3217_s7 + $0xe0] sm:$0xff] }
 0x165   :  { %v1755_v62 = vpop.f32.mrf.mxu0 }
 0x167   :  { %v1756_v2 = vpop.f32.mrf.mxu0 }
 0x168   :  { %v1757_v41 = vadd.f32 %v1756_v2, %v1755_v62  ;;  %v1073_v62 = vld [vmem:[%s3217_s7 + $0x60] sm:$0xff]  ;;  %v1088_v2 = vld [vmem:[%s3217_s7 + $0xd8] sm:$0xff] }
 0x169   :  { %v1758_v63 = vpop.f32.mrf.mxu0 }
 0x16b   :  { %v1759_v33 = vpop.f32.mrf.mxu0 }
 0x16c   :  { %v1760_v38 = vadd.f32 %v1759_v33, %v1758_v63  ;;  %v1072_v33 = vld [vmem:[%s3217_s7 + $0x58] sm:$0xff] }
 0x16d   :  { %v1761_v3 = vpop.f32.mrf.mxu0 }
 0x16f   :  { %v1762_v4 = vpop.f32.mrf.mxu0 }
 0x170   :  { %v1763_v37 = vadd.f32 %v1762_v4, %v1761_v3  ;;  %v1071_v3 = vld [vmem:[%s3217_s7 + $0x50] sm:$0xff]  ;;  %v560_v4 = vpop.trf.xlu0 }
 0x171   :  { %v1764_v54 = vpop.f32.mrf.mxu0 }
 0x173   :  { %v1765_v6 = vpop.f32.mrf.mxu0 }
 0x174   :  { %v1766_v16 = vadd.f32 %v1765_v6, %v1764_v54  ;;  %v1086_v54 = vld [vmem:[%s3217_s7 + $0xc8] sm:$0xff]  ;;  %v1085_v6 = vld [vmem:[%s3217_s7 + $0xc0] sm:$0xff] }
 0x175   :  { %v1767_v8 = vpop.f32.mrf.mxu0 }
 0x177   :  { %v1768_v9 = vpop.f32.mrf.mxu0 }
 0x178   :  { %v1769_v29 = vadd.f32 %v1768_v9, %v1767_v8  ;;  %v1069_v9 = vld [vmem:[%s3217_s7 + $0x40] sm:$0xff] }
 0x179   :  { %v1770_v10 = vpop.f32.mrf.mxu0 }
 0x17b   :  { %v1771_v11 = vpop.f32.mrf.mxu0 }
 0x17c   :  { %v1772_v25 = vadd.f32 %v1771_v11, %v1770_v10  ;;  %v1068_v10 = vld [vmem:[%s3217_s7 + $0x38] sm:$0xff]  ;;  %v561_v11 = vpop.trf.xlu0 }
 0x17d   :  { %v1773_v12 = vpop.f32.mrf.mxu0 }
 0x17f   :  { %v1774_v17 = vpop.f32.mrf.mxu0 }
 0x180   :  { %v1775_v35 = vadd.f32 %v1774_v17, %v1773_v12  ;;  %v1083_v12 = vld [vmem:[%s3217_s7 + $0xb0] sm:$0xff]  ;;  %v1082_v17 = vld [vmem:[%s3217_s7 + $0xa8] sm:$0xff] }
 0x181   :  { %v1776_v18 = vpop.f32.mrf.mxu0 }
 0x183   :  { %v1777_v0 = vpop.f32.mrf.mxu0 }
 0x184   :  { %v1778_v21 = vadd.f32 %v1777_v0, %v1776_v18  ;;  %v1066_v0 = vld [vmem:[%s3217_s7 + $0x28] sm:$0xff] }
 0x186   :  { %1955 = vmatprep.subr.mxu1 %v1778_v21 }
 0x187   :  { %1956 = vmatpush3.msra.mxu1 %v1778_v21  ;;  %v1081_v21 = vld [vmem:[%s3217_s7 + $0xa0] sm:$0xff] }
 0x188   :  { %1957 = vmatprep.subr.mxu1 %v1775_v35 }
 0x189   :  { %1958 = vmatpush3.msra.mxu1 %v1775_v35  ;;  %v562_v35 = vpop.trf.xlu0 }
 0x18a   :  { %1959 = vmatprep.subr.mxu1 %v1772_v25 }
 0x18b   :  { %1960 = vmatpush3.msra.mxu1 %v1772_v25  ;;  %v1080_v25 = vld [vmem:[%s3217_s7 + $0x98] sm:$0xff] }
 0x18c   :  { %1961 = vmatprep.subr.mxu1 %v1769_v29 }
 0x18d   :  { %1962 = vmatpush3.msra.mxu1 %v1769_v29  ;;  %v1064_v29 = vld [vmem:[%s3217_s7 + $0x18] sm:$0xff] }
 0x18e   :  { %1963 = vmatprep.subr.mxu1 %v1766_v16 }
 0x18f   :  { %1964 = vmatpush3.msra.mxu1 %v1766_v16  ;;  %v563_v16 = vpop.trf.xlu0 }
 0x190   :  { %1965 = vmatprep.subr.mxu1 %v1763_v37 }
 0x191   :  { %1966 = vmatpush3.msra.mxu1 %v1763_v37 }
 0x192   :  { %1967 = vmatprep.subr.mxu1 %v1760_v38 }
 0x193   :  { %1968 = vmatpush3.msra.mxu1 %v1760_v38 }
 0x194   :  { %1969 = vmatprep.subr.mxu1 %v1757_v41 }
 0x195   :  { %1970 = vmatpush3.msra.mxu1 %v1757_v41 }
 0x196   :  { %1971 = vmatprep.subr.mxu1 %v1754_v45 }
 0x197   :  { %1972 = vmatpush3.msra.mxu1 %v1754_v45 }
 0x198   :  { %1973 = vmatprep.subr.mxu1 %v1751_v48 }
 0x199   :  { %1974 = vmatpush3.msra.mxu1 %v1751_v48 }
 0x19a   :  { %1975 = vmatprep.subr.mxu1 %v1748_v52 }
 0x19b   :  { %1976 = vmatpush3.msra.mxu1 %v1748_v52  ;;  %v1095_v52 = vld [vmem:[%s3217_s7 + $0x110] sm:$0xff] }
 0x19c   :  { %1977 = vmatprep.subr.mxu1 %v2739_v20  ;;  %2037 = vmatprep.subr.mxu0 %v1095_v52 }
 0x19d   :  { %1978 = vmatpush3.msra.mxu1 %v2739_v20  ;;  %v2784_v20 = vpop.permute.xlu1 %873  ;;  %2038 = vmatpush3.msra.mxu0 %v1095_v52  ;;  %v517_v52 = vld [vmem:[%s3218_s2 + $0x8] sm:$0xff] }
 0x19e   :  { %1979 = vmatprep.subr.mxu1 %v2731_v47  ;;  %vm918_vm4 = vcmp.eq.s32.totalorder %v2784_v20, 1 }
 0x19f   :  { %1980 = vmatpush3.msra.mxu1 %v2731_v47  ;;  %v1076_v47 = vld [vmem:[%s3217_s7 + $0x78] sm:$0xff] }
 0x1a0   :  { %1981 = vmatprep.subr.mxu1 %v2723_v42 }
 0x1a1   :  { %1982 = vmatpush3.msra.mxu1 %v2723_v42  ;;  %v1091_v42 = vld [vmem:[%s3217_s7 + $0xf0] sm:$0xff]  ;;  %v2808_v63 = vpop.permute.xlu1 %761 }
 0x1a2   :  { %1983 = vmatprep.subr.mxu1 %v2715_v26  ;;  %vm806_vm6 = vcmp.eq.s32.totalorder %v2808_v63, 1 }
 0x1a3   :  { %1984 = vmatpush3.msra.mxu1 %v2715_v26  ;;  %v1075_v26 = vld [vmem:[%s3217_s7 + $0x70] sm:$0xff] }
 0x1a4   :  { %1985 = vmatprep.subr.mxu1 %v2707_v19 }
 0x1a5   :  { %1986 = vmatpush3.msra.mxu1 %v2707_v19  ;;  %v1090_v19 = vld [vmem:[%s3217_s7 + $0xe8] sm:$0xff]  ;;  %v2830_v8 = vpop.permute.xlu1 %876 }
 0x1a6   :  { %1988 = vmatmul.mubr.f32.vlgmr.msra.gmra.mxu1 %v2746_v13  ;;  %1811 = vmatprep.subr.mxu1 %v1092_v59  ;;  %v1087_v13 = vld [vmem:[%s3217_s7 + $0xd0] sm:$0xff]  ;;  %v1094_v59 = vld [vmem:[%s3217_s7 + $0x108] sm:$0xff]  ;;  %vm919_vm8 = vcmp.eq.s32.totalorder %v2830_v8, 1 }
 0x1a7   :  { %1990 = vmatprep.mubr.f32.mxu1 %v2748_v5  ;;  %1812 = vmatpush3.msra.mxu1 %v1076_v47  ;;  %v1070_v5 = vld [vmem:[%s3217_s7 + $0x48] sm:$0xff]  ;;  %v522_v8 = vld [vmem:[%s3218_s2 + $0x30] sm:$0xff] }
 0x1a8   :  { %1813 = vmatprep.subr.mxu1 %v1091_v42  ;;  %2039 = vmatprep.subr.mxu0 %v1094_v59  ;;  %v1062_v42 = vld [vmem:[%s3217_s7 + $0x8] sm:$0xff] }
 0x1a9   :  { %1814 = vmatpush3.msra.mxu1 %v1075_v26  ;;  %v2851_v18 = vpop.permute.xlu1 %764  ;;  %2040 = vmatpush3.msra.mxu0 %v1094_v59  ;;  %v1077_v26 = vld [vmem:[%s3217_s7 + $0x80] sm:$0xff]  ;;  %v519_v59 = vld [vmem:[%s3218_s2 + $0x18] sm:$0xff] }
 0x1aa   :  { %1991 = vmatmul.mubr.f32.gmra.mxu1 %v2750_v27  ;;  %1815 = vmatprep.subr.mxu1 %v1090_v19  ;;  %v1084_v27 = vld [vmem:[%s3217_s7 + $0xb8] sm:$0xff]  ;;  %v1093_v19 = vld [vmem:[%s3217_s7 + $0x100] sm:$0xff]  ;;  %vm807_vm10 = vcmp.eq.s32.totalorder %v2851_v18, 1 }
 0x1ab   :  { %1993 = vmatprep.mubr.f32.mxu1 %v2752_v15  ;;  %1816 = vmatpush3.msra.mxu1 %v1074_v23  ;;  %v1067_v15 = vld [vmem:[%s3217_s7 + $0x30] sm:$0xff]  ;;  %v1061_v23 = vld [vmem:[%s3217_s7] sm:$0xff] }
 0x1ac   :  { %1817 = vmatprep.subr.mxu1 %v1089_v30  ;;  %2041 = vmatprep.subr.mxu0 %v1093_v19 }
 0x1ad   :  { %1818 = vmatpush3.msra.mxu1 %v1073_v62  ;;  %2042 = vmatpush3.msra.mxu0 %v1093_v19  ;;  %v518_v19 = vld [vmem:[%s3218_s2 + $0x10] sm:$0xff] }
 0x1ae   :  { %1994 = vmatmul.mubr.f32.gmra.mxu1 %v2754_v24  ;;  %1819 = vmatprep.subr.mxu1 %v1088_v2  ;;  %v1065_v24 = vld [vmem:[%s3217_s7 + $0x20] sm:$0xff] }
 0x1af   :  { %1996 = vmatprep.mubr.f32.mxu1 %v2756_v32  ;;  %1820 = vmatpush3.msra.mxu1 %v1072_v33  ;;  %v2868_v32 = vpop.permute.xlu1 %879 }
 0x1b0   :  { %1821 = vmatprep.subr.mxu1 %v1087_v13  ;;  %vm920_vm12 = vcmp.eq.s32.totalorder %v2868_v32, 1 }
 0x1b1   :  { %1822 = vmatpush3.msra.mxu1 %v1071_v3 }
 0x1b2   :  { %1997 = vmatmul.mubr.f32.gmra.mxu1 %v2758_v40  ;;  %1823 = vmatprep.subr.mxu1 %v1086_v54 }
 0x1b3   :  { %1999 = vmatprep.mubr.f32.mxu1 %v556_v51  ;;  %1824 = vmatpush3.msra.mxu1 %v1070_v5  ;;  %v2870_v37 = vpop.permute.xlu1 %767  ;;  %v1079_v51 = vld [vmem:[%s3217_s7 + $0x90] sm:$0xff] }
 0x1b4   :  { %1825 = vmatprep.subr.mxu1 %v1085_v6  ;;  %vm808_vm14 = vcmp.eq.s32.totalorder %v2870_v37, 1  ;;  %v527_v37 = vld [vmem:[%s3218_s2 + $0x58] sm:$0xff] }
 0x1b5   :  { %1826 = vmatpush3.msra.mxu1 %v1069_v9 }
 0x1b6   :  { %2000 = vmatmul.mubr.f32.gmra.mxu1 %v557_v58  ;;  %1827 = vmatprep.subr.mxu1 %v1084_v27  ;;  %v1063_v58 = vld [vmem:[%s3217_s7 + $0x10] sm:$0xff] }
 0x1b7   :  { %2002 = vmatprep.mubr.f32.mxu1 %v558_v55  ;;  %1828 = vmatpush3.msra.mxu1 %v1068_v10  ;;  %v2872_v38 = vpop.permute.xlu1 %882  ;;  %v1078_v55 = vld [vmem:[%s3217_s7 + $0x88] sm:$0xff] }
 0x1b8   :  { %1829 = vmatprep.subr.mxu1 %v1083_v12 }
 0x1b9   :  { %1830 = vmatpush3.msra.mxu1 %v1067_v15 }
 0x1ba   :  { %2003 = vmatmul.mubr.f32.gmra.mxu1 %v559_v56  ;;  %1831 = vmatprep.subr.mxu1 %v1082_v17 }
 0x1bb   :  { %2005 = vmatprep.mubr.f32.mxu1 %v560_v4  ;;  %1832 = vmatpush3.msra.mxu1 %v1066_v0  ;;  %v2874_v40 = vpop.permute.xlu1 %770  ;;  %v989_v0 = vpop.permute.xlu0 %988 }
 0x1bc   :  { %1833 = vmatprep.subr.mxu1 %v1081_v21  ;;  %vm1031_vm5 = vcmp.eq.s32.totalorder %v989_v0, 1  ;;  %v523_v0 = vld [vmem:[%s3218_s2 + $0x38] sm:$0xff] }
 0x1bd   :  { %1834 = vmatpush3.msra.mxu1 %v1065_v24 }
 0x1be   :  { %2006 = vmatmul.mubr.f32.gmra.mxu1 %v561_v11  ;;  %1835 = vmatprep.subr.mxu1 %v1080_v25 }
 0x1bf   :  { %2008 = vmatprep.mubr.f32.mxu1 %v562_v35  ;;  %1836 = vmatpush3.msra.mxu1 %v1064_v29  ;;  %v2876_v41 = vpop.permute.xlu1 %885  ;;  %v2941_v24 = vpop.permute.xlu0 %909 }
 0x1c0   :  { %1837 = vmatprep.subr.mxu1 %v1079_v51  ;;  %v516_v51 = vld [vmem:[%s3218_s2] sm:$0xff] }
 0x1c1   :  { %1838 = vmatpush3.msra.mxu1 %v1063_v58 }
 0x1c2   :  { %2009 = vmatmul.mubr.f32.gmra.mxu1 %v563_v16  ;;  %1839 = vmatprep.subr.mxu1 %v1078_v55 }
 0x1c3   :  { %v2878_v45 = vpop.permute.xlu1 %773  ;;  %1840 = vmatpush3.msra.mxu1 %v1062_v42  ;;  %v2945_v25 = vpop.permute.xlu0 %797 }
 0x1c4   :  { %1841 = vmatprep.subr.mxu1 %v1077_v26 }
 0x1c5   :  { %1842 = vmatpush3.msra.mxu1 %v1061_v23 }
 0x1c7   :  { %v2880_v48 = vpop.permute.xlu1 %888  ;;  %v2963_v23 = vpop.permute.xlu0 %912 }
 0x1cb   :  { %v2897_v47 = vpop.permute.xlu1 %776 }
 0x1cf   :  { %v2911_v56 = vpop.permute.xlu1 %891 }
 0x1d3   :  { %v2913_v30 = vpop.permute.xlu1 %779 }
 0x1d7   :  { %v2915_v62 = vpop.permute.xlu1 %894 }
 0x1db   :  { %v2917_v2 = vpop.permute.xlu1 %782 }
 0x1df   :  { %v2919_v33 = vpop.permute.xlu1 %897 }
 0x1e3   :  { %v983_v13 = vpop.permute.xlu1 %982 }
 0x1e4   :  { %vm1029_vm1 = vcmp.eq.s32.totalorder %v983_v13, 1 }
 0x1e7   :  { %v2921_v3 = vpop.permute.xlu1 %785 }
 0x1eb   :  { %v986_v4 = vpop.permute.xlu1 %985 }
 0x1ec   :  { %vm1030_vm3 = vcmp.eq.s32.totalorder %v986_v4, 1  ;;  %v520_v4 = vld [vmem:[%s3218_s2 + $0x20] sm:$0xff] }
 0x1ef   :  { %v2923_v54 = vpop.permute.xlu1 %900 }
 0x1f3   :  { %v2925_v5 = vpop.permute.xlu1 %788 }
 0x1f7   :  { %v992_v6 = vpop.permute.xlu1 %991 }
 0x1f8   :  { %vm1032_vm7 = vcmp.eq.s32.totalorder %v992_v6, 1 }
 0x1fb   :  { %v2927_v9 = vpop.permute.xlu1 %903 }
 0x1ff   :  { %v995_v27 = vpop.permute.xlu1 %994 }
 0x200   :  { %vm1033_vm9 = vcmp.eq.s32.totalorder %v995_v27, 1 }
 0x203   :  { %v2929_v10 = vpop.permute.xlu1 %791 }
 0x207   :  { %v2931_v11 = vpop.permute.xlu1 %997 }
 0x208   :  { %vm1034_vm11 = vcmp.eq.s32.totalorder %v2931_v11, 1  ;;  %v524_v11 = vld [vmem:[%s3218_s2 + $0x40] sm:$0xff] }
 0x20b   :  { %v2933_v12 = vpop.permute.xlu1 %906 }
 0x20f   :  { %v2935_v15 = vpop.permute.xlu1 %1000 }
 0x210   :  { %vm1035_vm13 = vcmp.eq.s32.totalorder %v2935_v15, 1 }
 0x213   :  { %v2937_v17 = vpop.permute.xlu1 %794 }
 0x217   :  { %v2939_v21 = vpop.permute.xlu1 %1003 }
 0x218   :  { %vm1036_vm15 = vcmp.eq.s32.totalorder %v2939_v21, 1 }
 0x21b   :  { %v2943_v35 = vpop.permute.xlu1 %1006 }
 0x21f   :  { %v2947_v29 = vpop.permute.xlu1 %1009 }
 0x266   :  { %v1989_v16 = vpop.f32.mrf.mxu1 }
 0x267   :  { %v636_v42 = vadd.f32 %v1989_v16, %v517_v52  ;;  %v521_v16 = vld [vmem:[%s3218_s2 + $0x28] sm:$0xff] }
 0x268   :  { %v630_v58 = vpop.f32.mrf.mxu1 }
 0x269   :  { %v631_v55 = vadd.f32 %v630_v58, %v516_v51  ;;  %v2966_v51 = vpop.permute.xlu1 %1012 }
 0x26a   :  { %v1992_v26 = vpop.f32.mrf.mxu1 }
 0x26b   :  { %1634 = vmatprep.mubr.msk.f32.mxu1 %vm917_vm0, %v631_v55  ;;  %2043 = vmatprep.mubr.msk.f32.mxu0 %vm1029_vm1, %v631_v55  ;;  %v646_v58 = vadd.f32 %v1992_v26, %v519_v59  ;;  %vm921_vm0 = vcmp.eq.s32.totalorder %v2872_v38, 1  ;;  %vm1037_vm1 = vcmp.eq.s32.totalorder %v2943_v35, 1  ;;  %v526_v38 = vld [vmem:[%s3218_s2 + $0x50] sm:$0xff] }
 0x26c   :  { %v640_v49 = vpop.f32.mrf.mxu1  ;;  %1635 = vmatmul.mubr.msk.f32.vlgmr.msra.gmra.mxu1 %vm805_vm2, %v631_v55  ;;  %2044 = vmatmul.mubr.msk.f32.vlgmr.msra.gmra.mxu0 %vm1030_vm3, %v636_v42  ;;  %v2978_v55 = vpop.permute.xlu0 %800  ;;  %vm809_vm2 = vcmp.eq.s32.totalorder %v2874_v40, 1  ;;  %vm1038_vm3 = vcmp.eq.s32.totalorder %v2947_v29, 1 }
 0x26d   :  { %v641_v13 = vadd.f32 %v640_v49, %v518_v19  ;;  %1636 = vmatprep.mubr.msk.f32.mxu1 %vm918_vm4, %v636_v42  ;;  %v1016_v26 = vpop.permute.xlu1 %1015  ;;  %v525_v19 = vld [vmem:[%s3218_s2 + $0x48] sm:$0xff]  ;;  %vm922_vm4 = vcmp.eq.s32.totalorder %v2876_v41, 1  ;;  %v528_v41 = vld [vmem:[%s3218_s2 + $0x60] sm:$0xff] }
 0x26e   :  { %v1995_v61 = vpop.f32.mrf.mxu1 }
 0x26f   :  { %2046 = vmatprep.mubr.msk.f32.mxu0 %vm1031_vm5, %v641_v13  ;;  %v2976_v20 = vadd.f32 %v1995_v61, %v521_v16  ;;  %vm1039_vm5 = vcmp.eq.s32.totalorder %v2966_v51, 1  ;;  %v531_v51 = vld [vmem:[%s3218_s2 + $0x78] sm:$0xff] }
 0x270   :  { %v650_v52 = vpop.f32.mrf.mxu1  ;;  %1637 = vmatmul.mubr.msk.f32.gmra.mxu1 %vm806_vm6, %v636_v42  ;;  %2047 = vmatmul.mubr.msk.f32.gmra.mxu0 %vm1032_vm7, %v646_v58  ;;  %v3001_v32 = vpop.permute.xlu0 %915  ;;  %vm810_vm6 = vcmp.eq.s32.totalorder %v2878_v45, 1  ;;  %vm1040_vm7 = vcmp.eq.s32.totalorder %v1016_v26, 1  ;;  %v530_v45 = vld [vmem:[%s3218_s2 + $0x70] sm:$0xff] }
 0x271   :  { %v651_v59 = vadd.f32 %v650_v52, %v520_v4  ;;  %1638 = vmatprep.mubr.msk.f32.mxu1 %vm919_vm8, %v641_v13  ;;  %v1019_v49 = vpop.permute.xlu1 %1018  ;;  %v529_v52 = vld [vmem:[%s3218_s2 + $0x68] sm:$0xff]  ;;  %vm923_vm8 = vcmp.eq.s32.totalorder %v2880_v48, 1 }
 0x272   :  { %v1998_v63 = vpop.f32.mrf.mxu1 }
 0x273   :  { %2049 = vmatprep.mubr.msk.f32.mxu0 %vm1033_vm9, %v651_v59  ;;  %v2989_v6 = vadd.f32 %v1998_v63, %v523_v0  ;;  %vm1041_vm9 = vcmp.eq.s32.totalorder %v1019_v49, 1 }
 0x274   :  { %v660_v42 = vpop.f32.mrf.mxu1  ;;  %1639 = vmatmul.mubr.msk.f32.gmra.mxu1 %vm807_vm10, %v641_v13  ;;  %2050 = vmatmul.mubr.msk.f32.gmra.mxu0 %vm1034_vm11, %v2976_v20  ;;  %v3018_v4 = vpop.permute.xlu0 %803  ;;  %vm811_vm10 = vcmp.eq.s32.totalorder %v2897_v47, 1  ;;  %v3063_v47 = vld [vmem:[%s3219_s5] ss:$0 sm:$0xff] }
 0x275   :  { %v661_v27 = vadd.f32 %v660_v42, %v522_v8  ;;  %1640 = vmatprep.mubr.msk.f32.mxu1 %vm920_vm12, %v646_v58  ;;  %v1022_v40 = vpop.permute.xlu1 %1021  ;;  %vm924_vm12 = vcmp.eq.s32.totalorder %v2911_v56, 1  ;;  %v3221_v56 = vmov 1.0  }
 0x276   :  { %v2001_v18 = vpop.f32.mrf.mxu1  ;;  %vm1042_vm11 = vcmp.eq.s32.totalorder %v1022_v40, 1 }
 0x277   :  { %2052 = vmatprep.mubr.msk.f32.mxu0 %vm1035_vm13, %v661_v27  ;;  %v3004_v13 = vadd.f32 %v2001_v18, %v525_v19 }
 0x278   :  { %v670_v16 = vpop.f32.mrf.mxu1  ;;  %1641 = vmatmul.mubr.msk.f32.gmra.mxu1 %vm808_vm14, %v646_v58  ;;  %2053 = vmatmul.mubr.msk.f32.gmra.mxu0 %vm1036_vm15, %v2989_v6  ;;  %v1025_v48 = vpop.permute.xlu0 %1024  ;;  %vm812_vm14 = vcmp.eq.s32.totalorder %v2913_v30, 1 }
 0x279   :  { %v671_v15 = vadd.f32 %v670_v16, %v524_v11  ;;  %1642 = vmatprep.mubr.msk.f32.mxu1 %vm921_vm0, %v651_v59  ;;  %vm1043_vm13 = vcmp.eq.s32.totalorder %v1025_v48, 1  ;;  %vm925_vm0 = vcmp.eq.s32.totalorder %v2915_v62, 1 }
 0x27a   :  { %v2004_v21 = vpop.f32.mrf.mxu1 }
 0x27b   :  { %2055 = vmatprep.mubr.msk.f32.mxu0 %vm1037_vm1, %v671_v15  ;;  %v686_v58 = vadd.f32 %v2004_v21, %v527_v37  ;;  %vm813_vm1 = vcmp.eq.s32.totalorder %v2917_v2, 1 }
 0x27c   :  { %v680_v61 = vpop.f32.mrf.mxu1  ;;  %1643 = vmatmul.mubr.msk.f32.gmra.mxu1 %vm809_vm2, %v651_v59  ;;  %2056 = vmatmul.mubr.msk.f32.gmra.mxu0 %vm1038_vm3, %v3004_v13  ;;  %vm926_vm2 = vcmp.eq.s32.totalorder %v2919_v33, 1  ;;  %vm814_vm3 = vcmp.eq.s32.totalorder %v2921_v3, 1 }
 0x27d   :  { %v681_v35 = vadd.f32 %v680_v61, %v526_v38  ;;  %1644 = vmatprep.mubr.msk.f32.mxu1 %vm922_vm4, %v2976_v20  ;;  %vm927_vm4 = vcmp.eq.s32.totalorder %v2923_v54, 1 }
 0x27e   :  { %v2007_v29 = vpop.f32.mrf.mxu1 }
 0x27f   :  { %2058 = vmatprep.mubr.msk.f32.mxu0 %vm1039_vm5, %v681_v35  ;;  %v696_v59 = vadd.f32 %v2007_v29, %v529_v52  ;;  %vm815_vm5 = vcmp.eq.s32.totalorder %v2925_v5, 1 }
 0x280   :  { %v690_v0 = vpop.f32.mrf.mxu1  ;;  %1645 = vmatmul.mubr.msk.f32.gmra.mxu1 %vm810_vm6, %v2976_v20  ;;  %2059 = vmatmul.mubr.msk.f32.gmra.mxu0 %vm1040_vm7, %v686_v58  ;;  %v1028_v20 = vpop.permute.xlu1 %1027  ;;  %vm928_vm6 = vcmp.eq.s32.totalorder %v2927_v9, 1  ;;  %vm816_vm7 = vcmp.eq.s32.totalorder %v2929_v10, 1 }
 0x281   :  { %v691_v63 = vadd.f32 %v690_v0, %v528_v41  ;;  %1646 = vmatprep.mubr.msk.f32.mxu1 %vm923_vm8, %v661_v27  ;;  %vm1044_vm15 = vcmp.eq.s32.totalorder %v1028_v20, 1  ;;  %vm929_vm8 = vcmp.eq.s32.totalorder %v2933_v12, 1 }
 0x282   :  { %v2010_v8 = vpop.f32.mrf.mxu1 }
 0x283   :  { %2061 = vmatprep.mubr.msk.f32.mxu0 %vm1041_vm9, %v691_v63  ;;  %v706_v26 = vadd.f32 %v2010_v8, %v531_v51  ;;  %vm817_vm9 = vcmp.eq.s32.totalorder %v2937_v17, 1 }
 0x284   :  { %v700_v42 = vpop.f32.mrf.mxu1  ;;  %1647 = vmatmul.mubr.msk.f32.gmra.mxu1 %vm811_vm10, %v661_v27  ;;  %2062 = vmatmul.mubr.msk.f32.gmra.mxu0 %vm1042_vm11, %v696_v59  ;;  %vm930_vm10 = vcmp.eq.s32.totalorder %v2941_v24, 1  ;;  %vm818_vm11 = vcmp.eq.s32.totalorder %v2945_v25, 1 }
 0x285   :  { %v701_v19 = vadd.f32 %v700_v42, %v530_v45  ;;  %1648 = vmatprep.mubr.msk.f32.mxu1 %vm924_vm12, %v2989_v6  ;;  %vm931_vm12 = vcmp.eq.s32.totalorder %v2963_v23, 1 }
 0x287   :  { %2064 = vmatprep.mubr.msk.f32.mxu0 %vm1043_vm13, %v701_v19  ;;  %vm819_vm13 = vcmp.eq.s32.totalorder %v2978_v55, 1 }
 0x288   :  { %1649 = vmatmul.mubr.msk.f32.gmra.mxu1 %vm812_vm14, %v2989_v6  ;;  %2065 = vmatmul.mubr.msk.f32.gmra.mxu0 %vm1044_vm15, %v706_v26  ;;  %vm932_vm14 = vcmp.eq.s32.totalorder %v3001_v32, 1  ;;  %vm820_vm15 = vcmp.eq.s32.totalorder %v3018_v4, 1 }
 0x289   :  { %1650 = vmatprep.mubr.msk.f32.mxu1 %vm925_vm0, %v671_v15  ;;  %vm1404_vm0 = vcmp.eq.s32.totalorder %v2417_v28, %v3063_v47 }
 0x28a   :  { %2099 = vmatprep.mubr.msk.f32.mxu0 %vm1404_vm0, %v3221_v56 }
 0x28c   :  { %1651 = vmatmul.mubr.msk.f32.gmra.mxu1 %vm813_vm1, %v671_v15  ;;  %vm1412_vm1 = vcmp.eq.s32.totalorder %v2505_v57, %v3063_v47 }
 0x28d   :  { %1652 = vmatprep.mubr.msk.f32.mxu1 %vm926_vm2, %v3004_v13  ;;  %vm1405_vm2 = vcmp.eq.s32.totalorder %v2429_v31, %v3063_v47  ;;  %v3232_v31 = vld [vmem:[#allocation2_spill] sm:$0xff] }
 0x290   :  { %1653 = vmatmul.mubr.msk.f32.gmra.mxu1 %vm814_vm3, %v3004_v13  ;;  %vm1413_vm3 = vcmp.eq.s32.totalorder %v2513_v60, %v3063_v47 }
 0x291   :  { %1654 = vmatprep.mubr.msk.f32.mxu1 %vm927_vm4, %v681_v35  ;;  %vm1406_vm4 = vcmp.eq.s32.totalorder %v2442_v36, %v3063_v47  ;;  %v3233_v36 = vld [vmem:[#allocation4_spill] sm:$0xff] }
 0x294   :  { %1655 = vmatmul.mubr.msk.f32.gmra.mxu1 %vm815_vm5, %v681_v35  ;;  %vm1414_vm5 = vcmp.eq.s32.totalorder %v2526_v1, %v3063_v47 }
 0x295   :  { %1656 = vmatprep.mubr.msk.f32.mxu1 %vm928_vm6, %v686_v58  ;;  %vm1407_vm6 = vcmp.eq.s32.totalorder %v2450_v39, %v3063_v47  ;;  %v3234_v39 = vld [vmem:[#allocation3_spill] sm:$0xff] }
 0x298   :  { %1657 = vmatmul.mubr.msk.f32.gmra.mxu1 %vm816_vm7, %v686_v58  ;;  %vm1415_vm7 = vcmp.eq.s32.totalorder %v2537_v7, %v3063_v47 }
 0x299   :  { %1658 = vmatprep.mubr.msk.f32.mxu1 %vm929_vm8, %v691_v63  ;;  %vm1408_vm8 = vcmp.eq.s32.totalorder %v2463_v43, %v3063_v47  ;;  %v3235_v43 = vld [vmem:[#allocation5_spill] sm:$0xff] }
 0x29c   :  { %1659 = vmatmul.mubr.msk.f32.gmra.mxu1 %vm817_vm9, %v691_v63  ;;  %vm1416_vm9 = vcmp.eq.s32.totalorder %v2553_v14, %v3063_v47 }
 0x29d   :  { %1660 = vmatprep.mubr.msk.f32.mxu1 %vm930_vm10, %v696_v59  ;;  %vm1409_vm10 = vcmp.eq.s32.totalorder %v2471_v46, %v3063_v47 }
 0x2a0   :  { %1661 = vmatmul.mubr.msk.f32.gmra.mxu1 %vm818_vm11, %v696_v59  ;;  %vm1417_vm11 = vcmp.eq.s32.totalorder %v2564_v22, %v3063_v47 }
 0x2a1   :  { %1662 = vmatprep.mubr.msk.f32.mxu1 %vm931_vm12, %v701_v19  ;;  %vm1410_vm12 = vcmp.eq.s32.totalorder %v3232_v31, %v3063_v47 }
 0x2a4   :  { %1663 = vmatmul.mubr.msk.f32.gmra.mxu1 %vm819_vm13, %v701_v19  ;;  %vm1418_vm13 = vcmp.eq.s32.totalorder %v3233_v36, %v3063_v47 }
 0x2a5   :  { %1664 = vmatprep.mubr.msk.f32.mxu1 %vm932_vm14, %v706_v26  ;;  %vm1411_vm14 = vcmp.eq.s32.totalorder %v3234_v39, %v3063_v47 }
 0x2a8   :  { %1665 = vmatmul.mubr.msk.f32.gmra.mxu1 %vm820_vm15, %v706_v26  ;;  %vm1419_vm15 = vcmp.eq.s32.totalorder %v3235_v43, %v3063_v47 }
 0x2a9   :  { %2111 = vmatprep.mubr.msk.f32.mxu1 %vm1412_vm1, %v3221_v56 }
 0x32c   :  { %v1843_v30 = vpop.f32.mrf.mxu1  ;;  %v3073_v3 = vpop.f32.mrf.mxu0 }
 0x32e   :  { %v1844_v62 = vpop.f32.mrf.mxu1  ;;  %v3077_v28 = vpop.f32.mrf.mxu0 }
 0x32f   :  { %v3071_v2 = vadd.f32 %v1844_v62, %v1843_v30 }
 0x330   :  { %v1846_v33 = vpop.f32.mrf.mxu1  ;;  %v3081_v17 = vpop.f32.mrf.mxu0 }
 0x332   :  { %v1847_v54 = vpop.f32.mrf.mxu1  ;;  %v3085_v55 = vpop.f32.mrf.mxu0 }
 0x333   :  { %v3075_v5 = vadd.f32 %v1847_v54, %v1846_v33 }
 0x334   :  { %v1849_v9 = vpop.f32.mrf.mxu1  ;;  %v3091_v11 = vpop.f32.mrf.mxu0 }
 0x336   :  { %v1850_v10 = vpop.f32.mrf.mxu1  ;;  %v3097_v13 = vpop.f32.mrf.mxu0 }
 0x337   :  { %v3079_v57 = vadd.f32 %v1850_v10, %v1849_v9 }
 0x338   :  { %v1852_v12 = vpop.f32.mrf.mxu1  ;;  %v3101_v37 = vpop.f32.mrf.mxu0 }
 0x33a   :  { %v1853_v24 = vpop.f32.mrf.mxu1  ;;  %v3103_v58 = vpop.f32.mrf.mxu0 }
 0x33b   :  { %v3083_v25 = vadd.f32 %v1853_v24, %v1852_v12 }
 0x33c   :  { %v1855_v23 = vpop.f32.mrf.mxu1  ;;  %v2057_v35 = vpop.f32.mrf.mxu0 }
 0x33e   :  { %v1856_v6 = vpop.f32.mrf.mxu1  ;;  %v1360_v29 = vpop.f32.mrf.mxu0 }
 0x33f   :  { %v3087_v27 = vadd.f32 %v1856_v6, %v1855_v23 }
 0x340   :  { %v3089_v18 = vpop.f32.mrf.mxu1  ;;  %v2060_v0 = vpop.f32.mrf.mxu0 }
 0x342   :  { %v3093_v32 = vpop.f32.mrf.mxu1  ;;  %v1370_v8 = vpop.f32.mrf.mxu0 }
 0x344   :  { %v3095_v49 = vpop.f32.mrf.mxu1  ;;  %v2063_v20 = vpop.f32.mrf.mxu0 }
 0x346   :  { %v3099_v16 = vpop.f32.mrf.mxu1  ;;  %v1380_v19 = vpop.f32.mrf.mxu0 }
 0x348   :  { %v1864_v15 = vpop.f32.mrf.mxu1  ;;  %v2066_v33 = vpop.f32.mrf.mxu0 }
 0x34a   :  { %v1865_v21 = vpop.f32.mrf.mxu1  ;;  %v1390_v23 = vpop.f32.mrf.mxu0 }
 0x34c   :  { %v1867_v38 = vpop.f32.mrf.mxu1 }
 0x34e   :  { %v1868_v61 = vpop.f32.mrf.mxu1 }
 0x350   :  { %v1870_v4 = vpop.f32.mrf.mxu1 }
 0x352   :  { %v1871_v52 = vpop.f32.mrf.mxu1 }
 0x354   :  { %v1873_v40 = vpop.f32.mrf.mxu1 }
 0x356   :  { %v1874_v41 = vpop.f32.mrf.mxu1 }
 0x357   :  { %v1875_v34 = vadd.f32 %v1874_v41, %v1873_v40 }
 0x358   :  { %v1876_v59 = vpop.f32.mrf.mxu1 }
 0x35a   :  { %v1877_v63 = vpop.f32.mrf.mxu1 }
 0x35b   :  { %v1878_v44 = vadd.f32 %v1877_v63, %v1876_v59  ;;  %v1866_v59 = vadd.f32 %v1865_v21, %v1864_v15 }
 0x35c   :  { %v1879_v51 = vpop.f32.mrf.mxu1 }
 0x35e   :  { %v1880_v45 = vpop.f32.mrf.mxu1 }
 0x35f   :  { %v1881_v6 = vadd.f32 %v1880_v45, %v1879_v51  ;;  %v1869_v51 = vadd.f32 %v1868_v61, %v1867_v38  ;;  %v1371_v45 = vadd.f32 %v1875_v34, %v1370_v8  ;;  %v1356_v34 = vadd.f32 %v3101_v37, %v1866_v59 }
 0x360   :  { %v1882_v48 = vpop.f32.mrf.mxu1 }
 0x361   :  { %v1381_v50 = vadd.f32 %v1881_v6, %v1380_v19 }
 0x362   :  { %v1883_v26 = vpop.f32.mrf.mxu1 }
 0x363   :  { %v1884_v12 = vadd.f32 %v1883_v26, %v1882_v48  ;;  %v1872_v48 = vadd.f32 %v1871_v52, %v1870_v4  ;;  %v1376_v26 = vadd.f32 %v2060_v0, %v1878_v44  ;;  %v1361_v44 = vadd.f32 %v1869_v51, %v1360_v29 }
 0x364   :  { %v1885_v42 = vpop.f32.mrf.mxu1 }
 0x365   :  { %v1386_v53 = vadd.f32 %v2063_v20, %v1884_v12 }
 0x366   :  { %v1886_v30 = vpop.f32.mrf.mxu1 }
 0x367   :  { %v1887_v9 = vadd.f32 %v1886_v30, %v1885_v42 }
 0x368   :  { %v1888_v62 = vpop.f32.mrf.mxu1 }
 0x369   :  { %v1391_v56 = vadd.f32 %v1887_v9, %v1390_v23 }
 0x36a   :  { %v1889_v54 = vpop.f32.mrf.mxu1 }
 0x36b   :  { %v1890_v10 = vadd.f32 %v1889_v54, %v1888_v62 }
 0x36d   :  { %v1396_v24 = vadd.f32 %v2066_v33, %v1890_v10 }
 0x36f   :  { %2067 = vmatprep.subr.mxu0 %v1396_v24  ;;  %2123 = vmatprep.subr.mxu1 %v1396_v24 }
 0x370   :  { %2068 = vmatpush3.msra.mxu0 %v1396_v24  ;;  %2139 = vmatpush3.msra.mxu1 %v1396_v24 }
 0x371   :  { %2069 = vmatprep.subr.mxu0 %v1391_v56  ;;  %2124 = vmatprep.subr.mxu1 %v1391_v56 }
 0x372   :  { %2070 = vmatpush3.msra.mxu0 %v1391_v56  ;;  %2140 = vmatpush3.msra.mxu1 %v1391_v56  ;;  %v1366_v56 = vadd.f32 %v2057_v35, %v1872_v48 }
 0x373   :  { %2071 = vmatprep.subr.mxu0 %v1386_v53  ;;  %2125 = vmatprep.subr.mxu1 %v1386_v53 }
 0x374   :  { %2072 = vmatpush3.msra.mxu0 %v1386_v53  ;;  %2141 = vmatpush3.msra.mxu1 %v1386_v53  ;;  %v1863_v53 = vadd.f32 %v3099_v16, %v3095_v49 }
 0x375   :  { %2073 = vmatprep.subr.mxu0 %v1381_v50  ;;  %2126 = vmatprep.subr.mxu1 %v1381_v50 }
 0x376   :  { %2074 = vmatpush3.msra.mxu0 %v1381_v50  ;;  %2142 = vmatpush3.msra.mxu1 %v1381_v50  ;;  %v1860_v50 = vadd.f32 %v3093_v32, %v3089_v18  ;;  %v1351_v15 = vadd.f32 %v1863_v53, %v3103_v58  ;;  %v1341_v18 = vadd.f32 %v3087_v27, %v3097_v13 }
 0x377   :  { %2075 = vmatprep.subr.mxu0 %v1376_v26  ;;  %2127 = vmatprep.subr.mxu1 %v1376_v26  ;;  %v1336_v32 = vadd.f32 %v3081_v17, %v3083_v25  ;;  %v1326_v27 = vadd.f32 %v3073_v3, %v3075_v5  ;;  %v1321_v17 = vadd.f32 %v3071_v2, %v3077_v28  ;;  %v3231_v2 = vmov 1.0  }
 0x378   :  { %2076 = vmatpush3.msra.mxu0 %v1376_v26  ;;  %2143 = vmatpush3.msra.mxu1 %v1376_v26  ;;  %v1346_v49 = vadd.f32 %v3091_v11, %v1860_v50  ;;  %v1331_v11 = vadd.f32 %v3079_v57, %v3085_v55 }
 0x379   :  { %2077 = vmatprep.subr.mxu0 %v1371_v45  ;;  %2128 = vmatprep.subr.mxu1 %v1371_v45 }
 0x37a   :  { %2078 = vmatpush3.msra.mxu0 %v1371_v45  ;;  %2144 = vmatpush3.msra.mxu1 %v1371_v45 }
 0x37b   :  { %2079 = vmatprep.subr.mxu0 %v1366_v56  ;;  %2129 = vmatprep.subr.mxu1 %v1366_v56 }
 0x37c   :  { %2080 = vmatpush3.msra.mxu0 %v1366_v56  ;;  %2145 = vmatpush3.msra.mxu1 %v1366_v56 }
 0x37d   :  { %2081 = vmatprep.subr.mxu0 %v1361_v44  ;;  %2130 = vmatprep.subr.mxu1 %v1361_v44 }
 0x37e   :  { %2082 = vmatpush3.msra.mxu0 %v1361_v44  ;;  %2146 = vmatpush3.msra.mxu1 %v1361_v44 }
 0x37f   :  { %2083 = vmatprep.subr.mxu0 %v1356_v34  ;;  %2131 = vmatprep.subr.mxu1 %v1356_v34 }
 0x380   :  { %2084 = vmatpush3.msra.mxu0 %v1356_v34  ;;  %2147 = vmatpush3.msra.mxu1 %v1356_v34 }
 0x381   :  { %2085 = vmatprep.subr.mxu0 %v1351_v15  ;;  %2132 = vmatprep.subr.mxu1 %v1351_v15 }
 0x382   :  { %2086 = vmatpush3.msra.mxu0 %v1351_v15  ;;  %2148 = vmatpush3.msra.mxu1 %v1351_v15 }
 0x383   :  { %2087 = vmatprep.subr.mxu0 %v1346_v49  ;;  %2133 = vmatprep.subr.mxu1 %v1346_v49 }
 0x384   :  { %2088 = vmatpush3.msra.mxu0 %v1346_v49  ;;  %2149 = vmatpush3.msra.mxu1 %v1346_v49 }
 0x385   :  { %2089 = vmatprep.subr.mxu0 %v1341_v18  ;;  %2134 = vmatprep.subr.mxu1 %v1341_v18 }
 0x386   :  { %2090 = vmatpush3.msra.mxu0 %v1341_v18  ;;  %2150 = vmatpush3.msra.mxu1 %v1341_v18 }
 0x387   :  { %2091 = vmatprep.subr.mxu0 %v1336_v32  ;;  %2135 = vmatprep.subr.mxu1 %v1336_v32 }
 0x388   :  { %2092 = vmatpush3.msra.mxu0 %v1336_v32  ;;  %2151 = vmatpush3.msra.mxu1 %v1336_v32 }
 0x389   :  { %2093 = vmatprep.subr.mxu0 %v1331_v11  ;;  %2136 = vmatprep.subr.mxu1 %v1331_v11 }
 0x38a   :  { %2094 = vmatpush3.msra.mxu0 %v1331_v11  ;;  %2152 = vmatpush3.msra.mxu1 %v1331_v11 }
 0x38b   :  { %2095 = vmatprep.subr.mxu0 %v1326_v27  ;;  %2137 = vmatprep.subr.mxu1 %v1326_v27 }
 0x38c   :  { %2096 = vmatpush3.msra.mxu0 %v1326_v27  ;;  %2153 = vmatpush3.msra.mxu1 %v1326_v27 }
 0x38d   :  { %2097 = vmatprep.subr.mxu0 %v1321_v17  ;;  %2138 = vmatprep.subr.mxu1 %v1321_v17 }
 0x38e   :  { %2098 = vmatpush3.msra.mxu0 %v1321_v17  ;;  %2154 = vmatpush3.msra.mxu1 %v1321_v17 }
 0x38f   :  { %2100 = vmatmul.mubr.msk.f32.vlgmr.msra.gmra.mxu0 %vm1405_vm2, %v3231_v2  ;;  %2112 = vmatmul.mubr.msk.f32.vlgmr.msra.gmra.mxu1 %vm1413_vm3, %v3231_v2 }
 0x390   :  { %2102 = vmatprep.mubr.msk.f32.mxu0 %vm1406_vm4, %v3231_v2  ;;  %2114 = vmatprep.mubr.msk.f32.mxu1 %vm1414_vm5, %v3231_v2 }
 0x393   :  { %2103 = vmatmul.mubr.msk.f32.gmra.mxu0 %vm1407_vm6, %v3231_v2  ;;  %2115 = vmatmul.mubr.msk.f32.gmra.mxu1 %vm1415_vm7, %v3231_v2 }
 0x394   :  { %2105 = vmatprep.mubr.msk.f32.mxu0 %vm1408_vm8, %v3231_v2  ;;  %2117 = vmatprep.mubr.msk.f32.mxu1 %vm1416_vm9, %v3231_v2 }
 0x397   :  { %2106 = vmatmul.mubr.msk.f32.gmra.mxu0 %vm1409_vm10, %v3231_v2  ;;  %2118 = vmatmul.mubr.msk.f32.gmra.mxu1 %vm1417_vm11, %v3231_v2 }
 0x398   :  { %2108 = vmatprep.mubr.msk.f32.mxu0 %vm1410_vm12, %v3231_v2  ;;  %2120 = vmatprep.mubr.msk.f32.mxu1 %vm1418_vm13, %v3231_v2 }
 0x39b   :  { %2109 = vmatmul.mubr.msk.f32.gmra.mxu0 %vm1411_vm14, %v3231_v2  ;;  %2121 = vmatmul.mubr.msk.f32.gmra.mxu1 %vm1419_vm15, %v3231_v2 }
 0x44f   :  { %v2101_v46 = vpop.f32.mrf.mxu0  ;;  %v2113_v60 = vpop.f32.mrf.mxu1 }
 0x450   :  { %1582 = vst [vmem:[%s3220_s8 + $0x8] sm:$0xff] %v2101_v46  ;;  %1590 = vst [vmem:[%s3220_s8 + $0x48] sm:$0xff] %v2113_v60 }
 0x451   :  { %v1502_v1 = vpop.f32.mrf.mxu0  ;;  %v1542_v7 = vpop.f32.mrf.mxu1 }
 0x452   :  { %1581 = vst [vmem:[%s3220_s8] sm:$0xff] %v1502_v1  ;;  %1589 = vst [vmem:[%s3220_s8 + $0x40] sm:$0xff] %v1542_v7 }
 0x453   :  { %v2104_v14 = vpop.f32.mrf.mxu0  ;;  %v2116_v22 = vpop.f32.mrf.mxu1 }
 0x454   :  { %1584 = vst [vmem:[%s3220_s8 + $0x18] sm:$0xff] %v2104_v14  ;;  %1592 = vst [vmem:[%s3220_s8 + $0x58] sm:$0xff] %v2116_v22 }
 0x455   :  { %v1512_v47 = vpop.f32.mrf.mxu0  ;;  %v1552_v3 = vpop.f32.mrf.mxu1 }
 0x456   :  { %1583 = vst [vmem:[%s3220_s8 + $0x10] sm:$0xff] %v1512_v47  ;;  %1591 = vst [vmem:[%s3220_s8 + $0x50] sm:$0xff] %v1552_v3 }
 0x457   :  { %v2107_v5 = vpop.f32.mrf.mxu0  ;;  %v2119_v28 = vpop.f32.mrf.mxu1 }
 0x458   :  { %1586 = vst [vmem:[%s3220_s8 + $0x28] sm:$0xff] %v2107_v5  ;;  %1594 = vst [vmem:[%s3220_s8 + $0x68] sm:$0xff] %v2119_v28 }
 0x459   :  { %v1522_v57 = vpop.f32.mrf.mxu0  ;;  %v1562_v25 = vpop.f32.mrf.mxu1 }
 0x45a   :  { %1585 = vst [vmem:[%s3220_s8 + $0x20] sm:$0xff] %v1522_v57  ;;  %1593 = vst [vmem:[%s3220_s8 + $0x60] sm:$0xff] %v1562_v25 }
 0x45b   :  { %v2110_v55 = vpop.f32.mrf.mxu0  ;;  %v2122_v13 = vpop.f32.mrf.mxu1 }
 0x45c   :  { %1588 = vst [vmem:[%s3220_s8 + $0x38] sm:$0xff] %v2110_v55  ;;  %1596 = vst [vmem:[%s3220_s8 + $0x78] sm:$0xff] %v2122_v13 }
 0x45d   :  { %v1532_v16 = vpop.f32.mrf.mxu0  ;;  %v1572_v37 = vpop.f32.mrf.mxu1 }
 0x45e   :  { %1587 = vst [vmem:[%s3220_s8 + $0x30] sm:$0xff] %v1532_v16  ;;  %1595 = vst [vmem:[%s3220_s8 + $0x70] sm:$0xff] %v1572_v37 }

</bundles_post_ra>
